<compile_context>
chip_gen: v6e
topology: v6e:2x2x1
jax: 0.10.0
libtpu: 0.0.40
codegen_flags: <defaults>
</compile_context>

<pallas_src>
import functools

import jax
import jax.numpy as jnp
from jax.experimental import pallas as pl
from jax.experimental.pallas import tpu as pltpu


_VMEM_LIMIT = 48 * 1024 * 1024  # fits v5e/v6e (128 MiB) and v7x (64 MiB) with headroom

# Tile targets for the tiled matmul kernels (bf16; ~3 MiB resident incl.
# double-buffering, safely inside every generation's VMEM budget).
_TM = 256   # rows  (multiple of 8)
_TN = 512   # cols  (multiple of 128)
_TK = 512   # depth (multiple of 128)


# ----------------------------- small helpers ------------------------------

def _round_up(x, m):
    return ((x + m - 1) // m) * m


def _pick_tile(dim, target):
    """Return (tile, padded_dim). Full-dim blocks are always legal; otherwise
    use `target` (a multiple of the (8,128) alignment) and pad."""
    if dim <= target:
        return dim, dim
    return target, _round_up(dim, target)


def _pad2(x, rows, cols):
    r, c = x.shape
    if (r, c) == (rows, cols):
        return x
    return jnp.pad(x, ((0, rows - r), (0, cols - c)))


def _seq_tile(s, target=128):
    if s <= target:
        return s
    if s % target == 0:
        return target
    return s  # fallback: single tile (toy / odd sizes)


# ----------------------------- Pallas kernels -----------------------------

def _rmsnorm_kernel(x_ref, w_ref, o_ref, *, eps):
    x = x_ref[...].astype(jnp.float32)
    ms = jnp.mean(x * x, axis=-1, keepdims=True)
    normed = x * jax.lax.rsqrt(ms + eps)
    o_ref[...] = normed.astype(o_ref.dtype) * w_ref[...]


def rmsnorm(x, w, eps, *, tm_target=_TM):
    # x: (M, D), w: (1, D)
    M, D = x.shape
    tm, Mp = _pick_tile(M, tm_target)
    xp = _pad2(x, Mp, D)
    out = pl.pallas_call(
        functools.partial(_rmsnorm_kernel, eps=eps),
        out_shape=jax.ShapeDtypeStruct((Mp, D), x.dtype),
        grid_spec=pltpu.PrefetchScalarGridSpec(
            num_scalar_prefetch=0,
            grid=(Mp // tm,),
            in_specs=[pl.BlockSpec((tm, D), lambda i: (i, 0)),
                      pl.BlockSpec((1, D), lambda i: (0, 0))],
            out_specs=pl.BlockSpec((tm, D), lambda i: (i, 0))),
        compiler_params=pltpu.CompilerParams(
            dimension_semantics=("parallel",),
            vmem_limit_bytes=_VMEM_LIMIT),
    )(xp, w)
    return out[:M] if Mp != M else out


def _matmul_kernel(x_ref, w_ref, o_ref, acc_ref):
    @pl.when(pl.program_id(2) == 0)
    def _():
        acc_ref[...] = jnp.zeros_like(acc_ref)

    acc_ref[...] += jnp.dot(x_ref[...], w_ref[...],
                            preferred_element_type=jnp.float32)

    @pl.when(pl.program_id(2) == pl.num_programs(2) - 1)
    def _():
        o_ref[...] = acc_ref[...].astype(o_ref.dtype)


def _matmul_res_kernel(x_ref, w_ref, r_ref, o_ref, acc_ref):
    @pl.when(pl.program_id(2) == 0)
    def _():
        acc_ref[...] = jnp.zeros_like(acc_ref)

    acc_ref[...] += jnp.dot(x_ref[...], w_ref[...],
                            preferred_element_type=jnp.float32)

    @pl.when(pl.program_id(2) == pl.num_programs(2) - 1)
    def _():
        o_ref[...] = (acc_ref[...]
                      + r_ref[...].astype(jnp.float32)).astype(o_ref.dtype)


def linear(x, w_t, residual=None, *, out_dtype=None,
           tm_target=_TM, tn_target=_TN, tk_target=_TK):
    """Tiled matmul x @ w_t with optional fused residual add in the epilogue."""
    M, K = x.shape
    K2, N = w_t.shape
    assert K == K2
    out_dtype = out_dtype or x.dtype

    tm, Mp = _pick_tile(M, tm_target)
    tk, Kp = _pick_tile(K, tk_target)
    tn, Np = _pick_tile(N, tn_target)

    xp = _pad2(x, Mp, Kp)
    wp = _pad2(w_t, Kp, Np)

    in_specs = [pl.BlockSpec((tm, tk), lambda i, j, k: (i, k)),
                pl.BlockSpec((tk, tn), lambda i, j, k: (k, j))]
    args = [xp, wp]
    if residual is not None:
        rp = _pad2(residual.astype(out_dtype), Mp, Np)
        in_specs.append(pl.BlockSpec((tm, tn), lambda i, j, k: (i, j)))
        args.append(rp)
        kernel = _matmul_res_kernel
    else:
        kernel = _matmul_kernel

    out = pl.pallas_call(
        kernel,
        out_shape=jax.ShapeDtypeStruct((Mp, Np), out_dtype),
        grid_spec=pltpu.PrefetchScalarGridSpec(
            num_scalar_prefetch=0,
            grid=(Mp // tm, Np // tn, Kp // tk),
            in_specs=in_specs,
            out_specs=pl.BlockSpec((tm, tn), lambda i, j, k: (i, j)),
            scratch_shapes=[pltpu.VMEM((tm, tn), jnp.float32)]),
        compiler_params=pltpu.CompilerParams(
            dimension_semantics=("parallel", "parallel", "arbitrary"),
            vmem_limit_bytes=_VMEM_LIMIT),
    )(*args)
    return out[:M, :N] if (Mp, Np) != (M, N) else out


def _gate_kernel(x_ref, w1_ref, w3_ref, o_ref, acc1_ref, acc3_ref):
    @pl.when(pl.program_id(2) == 0)
    def _():
        acc1_ref[...] = jnp.zeros_like(acc1_ref)
        acc3_ref[...] = jnp.zeros_like(acc3_ref)

    x = x_ref[...]
    acc1_ref[...] += jnp.dot(x, w1_ref[...], preferred_element_type=jnp.float32)
    acc3_ref[...] += jnp.dot(x, w3_ref[...], preferred_element_type=jnp.float32)

    @pl.when(pl.program_id(2) == pl.num_programs(2) - 1)
    def _():
        h1 = acc1_ref[...]
        o_ref[...] = (h1 * jax.nn.sigmoid(h1) * acc3_ref[...]).astype(o_ref.dtype)


def gated_ffn_up(x, w1_t, w3_t, *, tm_target=_TM, tn_target=_TN, tk_target=_TK):
    """Fused SwiGLU up-projection: silu(x @ w1) * (x @ w3), tiled over hidden."""
    M, K = x.shape
    _, N = w1_t.shape

    tm, Mp = _pick_tile(M, tm_target)
    tk, Kp = _pick_tile(K, tk_target)
    tn, Np = _pick_tile(N, tn_target)

    xp = _pad2(x, Mp, Kp)
    w1p = _pad2(w1_t, Kp, Np)
    w3p = _pad2(w3_t, Kp, Np)

    out = pl.pallas_call(
        _gate_kernel,
        out_shape=jax.ShapeDtypeStruct((Mp, Np), x.dtype),
        grid_spec=pltpu.PrefetchScalarGridSpec(
            num_scalar_prefetch=0,
            grid=(Mp // tm, Np // tn, Kp // tk),
            in_specs=[pl.BlockSpec((tm, tk), lambda i, j, k: (i, k)),
                      pl.BlockSpec((tk, tn), lambda i, j, k: (k, j)),
                      pl.BlockSpec((tk, tn), lambda i, j, k: (k, j))],
            out_specs=pl.BlockSpec((tm, tn), lambda i, j, k: (i, j)),
            scratch_shapes=[pltpu.VMEM((tm, tn), jnp.float32),
                            pltpu.VMEM((tm, tn), jnp.float32)]),
        compiler_params=pltpu.CompilerParams(
            dimension_semantics=("parallel", "parallel", "arbitrary"),
            vmem_limit_bytes=_VMEM_LIMIT),
    )(xp, w1p, w3p)
    return out[:M, :N] if (Mp, Np) != (M, N) else out


def _flash_attn_kernel(q_ref, k_ref, v_ref, o_ref, m_sc, l_sc, acc_sc,
                       *, scale, tq, tkv):
    qi = pl.program_id(1)
    ki = pl.program_id(2)

    @pl.when(ki == 0)
    def _():
        m_sc[...] = jnp.full_like(m_sc, -jnp.inf)
        l_sc[...] = jnp.zeros_like(l_sc)
        acc_sc[...] = jnp.zeros_like(acc_sc)

    # Skip KV tiles that are entirely in the masked (future) region.
    @pl.when(ki * tkv <= qi * tq + (tq - 1))
    def _():
        q = q_ref[0]                      # (R, tq, D)  bf16
        k = k_ref[0]                      # (tkv, D)
        v = v_ref[0]                      # (tkv, D)
        s = jnp.einsum('rqd,kd->rqk', q, k,
                       preferred_element_type=jnp.float32) * scale
        row = qi * tq + jax.lax.broadcasted_iota(jnp.int32, (tq, tkv), 0)
        col = ki * tkv + jax.lax.broadcasted_iota(jnp.int32, (tq, tkv), 1)
        s = jnp.where((col <= row)[None, :, :], s, -1e30)  # causal mask
        m_prev = m_sc[...]                                  # (R, tq, 1)
        m_new = jnp.maximum(m_prev, s.max(axis=-1, keepdims=True))
        alpha = jnp.exp(m_prev - m_new)
        p = jnp.exp(s - m_new)
        l_sc[...] = alpha * l_sc[...] + p.sum(axis=-1, keepdims=True)
        acc_sc[...] = alpha * acc_sc[...] + jnp.einsum(
            'rqk,kd->rqd', p.astype(v.dtype), v,
            preferred_element_type=jnp.float32)
        m_sc[...] = m_new

    @pl.when(ki == pl.num_programs(2) - 1)
    def _():
        inv_l = pl.reciprocal(l_sc[...], approx=True)
        o_ref[0] = (acc_sc[...] * inv_l).astype(o_ref.dtype)


def attention(q_g, k_g, v_g, *, scale):
    # q_g: (Hkv, R, S, D)   k_g/v_g: (Hkv, S, D)   ->   out (Hkv, R, S, D)
    Hkv, R, S, D = q_g.shape
    tq = _seq_tile(S)
    tkv = _seq_tile(S)
    kernel = functools.partial(_flash_attn_kernel, scale=scale, tq=tq, tkv=tkv)
    return pl.pallas_call(
        kernel,
        out_shape=jax.ShapeDtypeStruct((Hkv, R, S, D), q_g.dtype),
        grid_spec=pltpu.PrefetchScalarGridSpec(
            num_scalar_prefetch=0,
            grid=(Hkv, S // tq, S // tkv),
            in_specs=[
                pl.BlockSpec((1, R, tq, D), lambda h, qi, ki: (h, 0, qi, 0)),
                pl.BlockSpec((1, tkv, D), lambda h, qi, ki: (h, ki, 0)),
                pl.BlockSpec((1, tkv, D), lambda h, qi, ki: (h, ki, 0)),
            ],
            out_specs=pl.BlockSpec((1, R, tq, D), lambda h, qi, ki: (h, 0, qi, 0)),
            scratch_shapes=[pltpu.VMEM((R, tq, 1), jnp.float32),
                            pltpu.VMEM((R, tq, 1), jnp.float32),
                            pltpu.VMEM((R, tq, D), jnp.float32)]),
        compiler_params=pltpu.CompilerParams(
            dimension_semantics=("parallel", "parallel", "arbitrary"),
            vmem_limit_bytes=_VMEM_LIMIT),
    )(q_g, k_g, v_g)


# ------------------------------- JAX glue ---------------------------------

def rope_cos_sin(positions, head_dim, theta=10000.0):
    inv = 1.0 / (theta ** (jnp.arange(0, head_dim, 2, dtype=jnp.float32) / head_dim))
    ang = positions.astype(jnp.float32)[:, None] * inv[None, :]   # (S, D/2)
    return jnp.cos(ang), jnp.sin(ang)


def apply_rope(x, cos, sin):
    # x: (S, H, D); pairs (2i, 2i+1) form the complex number (torch view_as_complex)
    S, H, D = x.shape
    xf = x.astype(jnp.float32).reshape(S, H, D // 2, 2)
    xr, xi = xf[..., 0], xf[..., 1]
    c, s = cos[:, None, :], sin[:, None, :]
    out = jnp.stack([xr * c - xi * s, xr * s + xi * c], axis=-1)
    return out.reshape(S, H, D).astype(x.dtype)


def init_params(key, *, dim, n_layers, head_dim, hidden_dim, n_heads, n_kv_heads,
                vocab_size, dtype=jnp.bfloat16):
    def dense(k, shape):
        return (0.05 * jax.random.normal(k, shape, dtype=jnp.float32)).astype(dtype)

    keys = jax.random.split(key, 2 + 7 * n_layers)
    params = {
        "tok_emb": dense(keys[0], (vocab_size, dim)),
        "output_t": dense(keys[1], (dim, vocab_size)),     # stored transposed
        "norm": jnp.ones((1, dim), dtype=dtype),
    }
    wqkv, wo, w1, w3, w2 = [], [], [], [], []
    for l in range(n_layers):
        k = keys[2 + 7 * l: 2 + 7 * (l + 1)]
        wq_t = dense(k[0], (dim, n_heads * head_dim))
        wk_t = dense(k[1], (dim, n_kv_heads * head_dim))
        wv_t = dense(k[2], (dim, n_kv_heads * head_dim))
        wqkv.append(jnp.concatenate([wq_t, wk_t, wv_t], axis=1))  # fused QKV
        wo.append(dense(k[3], (n_heads * head_dim, dim)))
        w1.append(dense(k[4], (dim, hidden_dim)))
        w3.append(dense(k[5], (dim, hidden_dim)))
        w2.append(dense(k[6], (hidden_dim, dim)))
    params["layers"] = {
        "attn_norm": jnp.ones((n_layers, 1, dim), dtype=dtype),
        "ffn_norm": jnp.ones((n_layers, 1, dim), dtype=dtype),
        "wqkv_t": jnp.stack(wqkv),
        "wo_t": jnp.stack(wo),
        "w1_t": jnp.stack(w1),
        "w3_t": jnp.stack(w3),
        "w2_t": jnp.stack(w2),
    }
    return params


def transformer_forward(params, input_ids, *, n_heads, n_kv_heads, head_dim,
                        norm_eps):
    S = input_ids.shape[0]
    repeats = n_heads // n_kv_heads
    positions = jnp.arange(S, dtype=jnp.int32)          # fresh cache => 0..S-1
    cos, sin = rope_cos_sin(positions, head_dim)
    scale = head_dim ** -0.5
    qd = n_heads * head_dim
    kd = n_kv_heads * head_dim

    h = jnp.take(params["tok_emb"], input_ids, axis=0)  # (S, dim) bf16

    def layer_step(h, lp):
        # ---- attention block ----
        xn = rmsnorm(h, lp["attn_norm"], norm_eps)
        qkv = linear(xn, lp["wqkv_t"])                   # fused Q|K|V projection
        q = qkv[:, :qd].reshape(S, n_heads, head_dim)
        k = qkv[:, qd:qd + kd].reshape(S, n_kv_heads, head_dim)
        v = qkv[:, qd + kd:].reshape(S, n_kv_heads, head_dim)
        q = apply_rope(q, cos, sin)
        k = apply_rope(k, cos, sin)
        # GQA-grouped, head-major layout: q head (kvh*repeats + r) -> kv head kvh
        q_g = jnp.transpose(q.reshape(S, n_kv_heads, repeats, head_dim),
                            (1, 2, 0, 3))                # (Hkv, R, S, D)
        k_g = jnp.transpose(k, (1, 0, 2))                # (Hkv, S, D)
        v_g = jnp.transpose(v, (1, 0, 2))
        o_g = attention(q_g, k_g, v_g, scale=scale)      # (Hkv, R, S, D)
        o = jnp.transpose(o_g, (2, 0, 1, 3)).reshape(S, n_heads * head_dim)
        h = linear(o, lp["wo_t"], residual=h)            # residual fused in epilogue

        # ---- feed-forward block ----
        xn = rmsnorm(h, lp["ffn_norm"], norm_eps)
        g = gated_ffn_up(xn, lp["w1_t"], lp["w3_t"])     # silu(w1 x) * (w3 x)
        h = linear(g, lp["w2_t"], residual=h)            # residual fused in epilogue
        return h, None

    h, _ = jax.lax.scan(layer_step, h, params["layers"])

    h = rmsnorm(h, params["norm"], norm_eps)
    logits = linear(h, params["output_t"], out_dtype=jnp.float32)
    return logits


if __name__ == "__main__":
    # Small, self-consistent Mistral-like config.
    dim = 32
    n_layers = 2
    n_heads = 4
    n_kv_heads = 2
    head_dim = 8
    hidden_dim = 64
    vocab_size = 64
    sliding_window = 128        # >= seq => causal mask
    norm_eps = 1e-5
    seq = 8

    key = jax.random.PRNGKey(0)
    pkey, ikey = jax.random.split(key)
    params = init_params(
        pkey, dim=dim, n_layers=n_layers, head_dim=head_dim,
        hidden_dim=hidden_dim, n_heads=n_heads, n_kv_heads=n_kv_heads,
        vocab_size=vocab_size, dtype=jnp.bfloat16,
    )
    input_ids = jax.random.randint(ikey, (seq,), 0, vocab_size, dtype=jnp.int32)

    fwd = jax.jit(functools.partial(
        transformer_forward,
        n_heads=n_heads, n_kv_heads=n_kv_heads, head_dim=head_dim,
        norm_eps=norm_eps,
    ))
    logits = fwd(params, input_ids)
    logits = jax.block_until_ready(logits)
    assert logits.shape == (seq, vocab_size)
    assert logits.dtype == jnp.float32
    assert bool(jnp.all(jnp.isfinite(logits)))
    print("KERNEL_OK")
</pallas_src>

<mosaic_0001>
module attributes {stable_mosaic.version = 11 : i64} {
  func.func @_rmsnorm_kernel(%arg0: i32, %arg1: memref<8x32xbf16, #tpu.memory_space<vmem>>, %arg2: memref<1x32xbf16, #tpu.memory_space<vmem>>, %arg3: memref<8x32xbf16, #tpu.memory_space<vmem>>) attributes {dimension_semantics = [#tpu.dimension_semantics<parallel>], iteration_bounds = array<i64: 1>, scalar_prefetch = 0 : i64, scratch_operands = 0 : i64, tpu.core_type = #tpu.core_type<tc>, window_params = [{transform_indices = @transform_0, window_bounds = array<i64: 8, 32>}, {pipeline_mode = #tpu.pipeline_mode<synchronous>, transform_indices = @transform_1, window_bounds = array<i64: 1, 32>}, {transform_indices = @transform_2, window_bounds = array<i64: 8, 32>}]} {
    %c0 = arith.constant 0 : index
    %c0_0 = arith.constant 0 : index
    %0 = vector.load %arg1[%c0, %c0_0] : memref<8x32xbf16, #tpu.memory_space<vmem>>, vector<8x32xbf16>
    %1 = arith.extf %0 : vector<8x32xbf16> to vector<8x32xf32>
    %2 = arith.mulf %1, %1 : vector<8x32xf32>
    %cst = arith.constant dense<0.000000e+00> : vector<8xf32>
    %3 = vector.multi_reduction <add>, %2, %cst [1] : vector<8x32xf32> to vector<8xf32>
    %4 = vector.shape_cast %3 : vector<8xf32> to vector<8x1xf32>
    %cst_1 = arith.constant 3.200000e+01 : f32
    %5 = vector.broadcast %cst_1 : f32 to vector<8x1xf32>
    %6 = arith.divf %4, %5 : vector<8x1xf32>
    %cst_2 = arith.constant 9.99999974E-6 : f32
    %7 = vector.broadcast %cst_2 : f32 to vector<8x1xf32>
    %8 = arith.addf %6, %7 : vector<8x1xf32>
    %9 = math.rsqrt %8 : vector<8x1xf32>
    %10 = vector.broadcast %9 : vector<8x1xf32> to vector<8x32xf32>
    %11 = arith.mulf %1, %10 : vector<8x32xf32>
    %12 = arith.truncf %11 : vector<8x32xf32> to vector<8x32xbf16>
    %c0_3 = arith.constant 0 : index
    %c0_4 = arith.constant 0 : index
    %13 = vector.load %arg2[%c0_3, %c0_4] : memref<1x32xbf16, #tpu.memory_space<vmem>>, vector<1x32xbf16>
    %14 = vector.broadcast %13 : vector<1x32xbf16> to vector<8x32xbf16>
    %15 = arith.mulf %12, %14 : vector<8x32xbf16>
    %c0_5 = arith.constant 0 : index
    %c0_6 = arith.constant 0 : index
    %16 = vector.load %arg3[%c0_5, %c0_6] : memref<8x32xbf16, #tpu.memory_space<vmem>>, vector<8x32xbf16>
    tpu.vector_store %arg3[%c0_5, %c0_6], %15 {strides = array<i32>} : memref<8x32xbf16, #tpu.memory_space<vmem>>, vector<8x32xbf16>,
    return
  }
  func.func @transform_0(%arg0: i32) -> (i32, i32) {
    %c0_i32 = arith.constant 0 : i32
    %c0_i32_0 = arith.constant 0 : i32
    return %arg0, %c0_i32 : i32, i32
  }
  func.func @transform_1(%arg0: i32) -> (i32, i32) {
    %c0_i32 = arith.constant 0 : i32
    %c0_i32_0 = arith.constant 0 : i32
    %c0_i32_1 = arith.constant 0 : i32
    return %c0_i32, %c0_i32_0 : i32, i32
  }
  func.func @transform_2(%arg0: i32) -> (i32, i32) {
    %c0_i32 = arith.constant 0 : i32
    %c0_i32_0 = arith.constant 0 : i32
    return %arg0, %c0_i32 : i32, i32
  }
}

module attributes {stable_mosaic.version = 11 : i64} {
  func.func @_matmul_kernel(%arg0: i32, %arg1: i32, %arg2: i32, %arg3: memref<8x32xbf16, #tpu.memory_space<vmem>>, %arg4: memref<32x64xbf16, #tpu.memory_space<vmem>>, %arg5: memref<8x64xbf16, #tpu.memory_space<vmem>>, %arg6: memref<8x64xf32, #tpu.memory_space<vmem>>) attributes {dimension_semantics = [#tpu.dimension_semantics<parallel>, #tpu.dimension_semantics<parallel>, #tpu.dimension_semantics<arbitrary>], iteration_bounds = array<i64: 1, 1, 1>, scalar_prefetch = 0 : i64, scratch_operands = 1 : i64, tpu.core_type = #tpu.core_type<tc>, window_params = [{transform_indices = @transform_0, window_bounds = array<i64: 8, 32>}, {transform_indices = @transform_1, window_bounds = array<i64: 32, 64>}, {transform_indices = @transform_2, window_bounds = array<i64: 8, 64>}]} {
    %c0_i32 = arith.constant 0 : i32
    %0 = arith.cmpi eq, %arg2, %c0_i32 : i32
    %1 = arith.extui %0 : i1 to i32
    %c0_i32_0 = arith.constant 0 : i32
    %2 = arith.cmpi ne, %1, %c0_i32_0 : i32
    scf.if %2 {
      %cst_10 = arith.constant 0.000000e+00 : f32
      %12 = vector.broadcast %cst_10 : f32 to vector<8x64xf32>
      %c0_11 = arith.constant 0 : index
      %c0_12 = arith.constant 0 : index
      %13 = vector.load %arg6[%c0_11, %c0_12] : memref<8x64xf32, #tpu.memory_space<vmem>>, vector<8x64xf32>
      tpu.vector_store %arg6[%c0_11, %c0_12], %12 {strides = array<i32>} : memref<8x64xf32, #tpu.memory_space<vmem>>, vector<8x64xf32>,
    } else {
    }
    %c0 = arith.constant 0 : index
    %c0_1 = arith.constant 0 : index
    %3 = vector.load %arg6[%c0, %c0_1] : memref<8x64xf32, #tpu.memory_space<vmem>>, vector<8x64xf32>
    %c0_2 = arith.constant 0 : index
    %c0_3 = arith.constant 0 : index
    %4 = vector.load %arg3[%c0_2, %c0_3] : memref<8x32xbf16, #tpu.memory_space<vmem>>, vector<8x32xbf16>
    %c0_4 = arith.constant 0 : index
    %c0_5 = arith.constant 0 : index
    %5 = vector.load %arg4[%c0_4, %c0_5] : memref<32x64xbf16, #tpu.memory_space<vmem>>, vector<32x64xbf16>
    %cst = arith.constant dense<0.000000e+00> : vector<8x64xf32>
    %6 = tpu.matmul %4, %5, %cst {dimension_numbers = #tpu.dot_dimension_numbers<[1], [0], [0], [1], [0, 0, 1, 1], [], []>} : vector<8x32xbf16>, vector<32x64xbf16>, vector<8x64xf32> -> vector<8x64xf32>
    %7 = arith.addf %3, %6 : vector<8x64xf32>
    %c0_6 = arith.constant 0 : index
    %c0_7 = arith.constant 0 : index
    %8 = vector.load %arg6[%c0_6, %c0_7] : memref<8x64xf32, #tpu.memory_space<vmem>>, vector<8x64xf32>
    tpu.vector_store %arg6[%c0_6, %c0_7], %7 {strides = array<i32>} : memref<8x64xf32, #tpu.memory_space<vmem>>, vector<8x64xf32>,
    %c0_i32_8 = arith.constant 0 : i32
    %9 = arith.cmpi eq, %arg2, %c0_i32_8 : i32
    %10 = arith.extui %9 : i1 to i32
    %c0_i32_9 = arith.constant 0 : i32
    %11 = arith.cmpi ne, %10, %c0_i32_9 : i32
    scf.if %11 {
      %c0_10 = arith.constant 0 : index
      %c0_11 = arith.constant 0 : index
      %12 = vector.load %arg6[%c0_10, %c0_11] : memref<8x64xf32, #tpu.memory_space<vmem>>, vector<8x64xf32>
      %13 = arith.truncf %12 : vector<8x64xf32> to vector<8x64xbf16>
      %c0_12 = arith.constant 0 : index
      %c0_13 = arith.constant 0 : index
      %14 = vector.load %arg5[%c0_12, %c0_13] : memref<8x64xbf16, #tpu.memory_space<vmem>>, vector<8x64xbf16>
      tpu.vector_store %arg5[%c0_12, %c0_13], %13 {strides = array<i32>} : memref<8x64xbf16, #tpu.memory_space<vmem>>, vector<8x64xbf16>,
    } else {
    }
    return
  }
  func.func @transform_0(%arg0: i32, %arg1: i32, %arg2: i32) -> (i32, i32) {
    %c0_i32 = arith.constant 0 : i32
    return %arg0, %arg2 : i32, i32
  }
  func.func @transform_1(%arg0: i32, %arg1: i32, %arg2: i32) -> (i32, i32) {
    %c0_i32 = arith.constant 0 : i32
    return %arg2, %arg1 : i32, i32
  }
  func.func @transform_2(%arg0: i32, %arg1: i32, %arg2: i32) -> (i32, i32) {
    %c0_i32 = arith.constant 0 : i32
    return %arg0, %arg1 : i32, i32
  }
}

module attributes {stable_mosaic.version = 11 : i64} {
  func.func @_flash_attn_kernel(%arg0: i32, %arg1: i32, %arg2: i32, %arg3: memref<1x2x8x8xbf16, #tpu.memory_space<vmem>>, %arg4: memref<1x8x8xbf16, #tpu.memory_space<vmem>>, %arg5: memref<1x8x8xbf16, #tpu.memory_space<vmem>>, %arg6: memref<1x2x8x8xbf16, #tpu.memory_space<vmem>>, %arg7: memref<2x8x1xf32, #tpu.memory_space<vmem>>, %arg8: memref<2x8x1xf32, #tpu.memory_space<vmem>>, %arg9: memref<2x8x8xf32, #tpu.memory_space<vmem>>) attributes {dimension_semantics = [#tpu.dimension_semantics<parallel>, #tpu.dimension_semantics<parallel>, #tpu.dimension_semantics<arbitrary>], iteration_bounds = array<i64: 2, 1, 1>, scalar_prefetch = 0 : i64, scratch_operands = 3 : i64, tpu.core_type = #tpu.core_type<tc>, window_params = [{transform_indices = @transform_0, window_bounds = array<i64: 1, 2, 8, 8>}, {transform_indices = @transform_1, window_bounds = array<i64: 1, 8, 8>}, {transform_indices = @transform_2, window_bounds = array<i64: 1, 8, 8>}, {transform_indices = @transform_3, window_bounds = array<i64: 1, 2, 8, 8>}]} {
    %c0_i32 = arith.constant 0 : i32
    %0 = arith.cmpi eq, %arg2, %c0_i32 : i32
    %1 = arith.extui %0 : i1 to i32
    %c0_i32_0 = arith.constant 0 : i32
    %2 = arith.cmpi ne, %1, %c0_i32_0 : i32
    scf.if %2 {
      %cst = arith.constant 0xFF800000 : f32
      %12 = vector.broadcast %cst : f32 to vector<2x8x1xf32>
      %c0 = arith.constant 0 : index
      %c0_5 = arith.constant 0 : index
      %c0_6 = arith.constant 0 : index
      %13 = vector.load %arg7[%c0, %c0_5, %c0_6] : memref<2x8x1xf32, #tpu.memory_space<vmem>>, vector<2x8x1xf32>
      tpu.vector_store %arg7[%c0, %c0_5, %c0_6], %12 {strides = array<i32>} : memref<2x8x1xf32, #tpu.memory_space<vmem>>, vector<2x8x1xf32>,
      %cst_7 = arith.constant 0.000000e+00 : f32
      %14 = vector.broadcast %cst_7 : f32 to vector<2x8x1xf32>
      %c0_8 = arith.constant 0 : index
      %c0_9 = arith.constant 0 : index
      %c0_10 = arith.constant 0 : index
      %15 = vector.load %arg8[%c0_8, %c0_9, %c0_10] : memref<2x8x1xf32, #tpu.memory_space<vmem>>, vector<2x8x1xf32>
      tpu.vector_store %arg8[%c0_8, %c0_9, %c0_10], %14 {strides = array<i32>} : memref<2x8x1xf32, #tpu.memory_space<vmem>>, vector<2x8x1xf32>,
      %cst_11 = arith.constant 0.000000e+00 : f32
      %16 = vector.broadcast %cst_11 : f32 to vector<2x8x8xf32>
      %c0_12 = arith.constant 0 : index
      %c0_13 = arith.constant 0 : index
      %c0_14 = arith.constant 0 : index
      %17 = vector.load %arg9[%c0_12, %c0_13, %c0_14] : memref<2x8x8xf32, #tpu.memory_space<vmem>>, vector<2x8x8xf32>
      tpu.vector_store %arg9[%c0_12, %c0_13, %c0_14], %16 {strides = array<i32>} : memref<2x8x8xf32, #tpu.memory_space<vmem>>, vector<2x8x8xf32>,
    } else {
    }
    %c8_i32 = arith.constant 8 : i32
    %3 = arith.muli %arg2, %c8_i32 : i32
    %c8_i32_1 = arith.constant 8 : i32
    %4 = arith.muli %arg1, %c8_i32_1 : i32
    %c7_i32 = arith.constant 7 : i32
    %5 = arith.addi %4, %c7_i32 : i32
    %6 = arith.cmpi sle, %3, %5 : i32
    %7 = arith.extui %6 : i1 to i32
    %c0_i32_2 = arith.constant 0 : i32
    %8 = arith.cmpi ne, %7, %c0_i32_2 : i32
    scf.if %8 {
      %c0 = arith.constant 0 : index
      %c0_5 = arith.constant 0 : index
      %c0_6 = arith.constant 0 : index
      %c0_7 = arith.constant 0 : index
      %12 = vector.load %arg3[%c0, %c0_5, %c0_6, %c0_7] : memref<1x2x8x8xbf16, #tpu.memory_space<vmem>>, vector<1x2x8x8xbf16>
      %13 = vector.shape_cast %12 : vector<1x2x8x8xbf16> to vector<2x8x8xbf16>
      %c0_8 = arith.constant 0 : index
      %c0_9 = arith.constant 0 : index
      %c0_10 = arith.constant 0 : index
      %14 = vector.load %arg4[%c0_8, %c0_9, %c0_10] : memref<1x8x8xbf16, #tpu.memory_space<vmem>>, vector<1x8x8xbf16>
      %15 = vector.shape_cast %14 : vector<1x8x8xbf16> to vector<8x8xbf16>
      %c0_11 = arith.constant 0 : index
      %c0_12 = arith.constant 0 : index
      %c0_13 = arith.constant 0 : index
      %16 = vector.load %arg5[%c0_11, %c0_12, %c0_13] : memref<1x8x8xbf16, #tpu.memory_space<vmem>>, vector<1x8x8xbf16>
      %17 = vector.shape_cast %16 : vector<1x8x8xbf16> to vector<8x8xbf16>
      "tpu.trace_start"() <{level = 10 : i32, message = "rqd,kd->rqk"}> : () -> ()
      %cst = arith.constant dense<0.000000e+00> : vector<2x8x8xf32>
      %18 = tpu.matmul %13, %15, %cst {dimension_numbers = #tpu.dot_dimension_numbers<[2], [1], [0, 1], [0], [0, 0, 0, 1, 1, 0], [], []>} : vector<2x8x8xbf16>, vector<8x8xbf16>, vector<2x8x8xf32> -> vector<2x8x8xf32>
      "tpu.trace_stop"() : () -> ()
      %cst_14 = arith.constant 0.353553385 : f32
      %19 = vector.broadcast %cst_14 : f32 to vector<2x8x8xf32>
      %20 = arith.mulf %18, %19 : vector<2x8x8xf32>
      %c8_i32_15 = arith.constant 8 : i32
      %21 = arith.muli %arg1, %c8_i32_15 : i32
      %22 = tpu.iota {dimensions = array<i32: 0>} : vector<8x8xi32>
      %23 = vector.broadcast %21 : i32 to vector<8x8xi32>
      %24 = arith.addi %23, %22 : vector<8x8xi32>
      %c8_i32_16 = arith.constant 8 : i32
      %25 = arith.muli %arg2, %c8_i32_16 : i32
      %26 = tpu.iota {dimensions = array<i32: 1>} : vector<8x8xi32>
      %27 = vector.broadcast %25 : i32 to vector<8x8xi32>
      %28 = arith.addi %27, %26 : vector<8x8xi32>
      %29 = arith.cmpi sle, %28, %24 : vector<8x8xi32>
      %30 = vector.shape_cast %29 : vector<8x8xi1> to vector<1x8x8xi1>
      %cst_17 = arith.constant -1.000000e+30 : f32
      %31 = vector.shape_cast %30 : vector<1x8x8xi1> to vector<1x8x8xi1>
      %32 = vector.broadcast %31 : vector<1x8x8xi1> to vector<2x8x8xi1>
      %33 = vector.broadcast %cst_17 : f32 to vector<2x8x8xf32>
      %34 = arith.select %32, %20, %33 : vector<2x8x8xi1>, vector<2x8x8xf32>
      %c0_18 = arith.constant 0 : index
      %c0_19 = arith.constant 0 : index
      %c0_20 = arith.constant 0 : index
      %35 = vector.load %arg7[%c0_18, %c0_19, %c0_20] : memref<2x8x1xf32, #tpu.memory_space<vmem>>, vector<2x8x1xf32>
      %cst_21 = arith.constant dense<0xFF800000> : vector<2x8xf32>
      %36 = vector.multi_reduction <maximumf>, %34, %cst_21 [2] : vector<2x8x8xf32> to vector<2x8xf32>
      %37 = vector.shape_cast %36 : vector<2x8xf32> to vector<2x8x1xf32>
      %38 = arith.maximumf %35, %37 : vector<2x8x1xf32>
      %39 = arith.subf %35, %38 : vector<2x8x1xf32>
      %40 = math.exp %39 : vector<2x8x1xf32>
      %41 = vector.broadcast %38 : vector<2x8x1xf32> to vector<2x8x8xf32>
      %42 = arith.subf %34, %41 : vector<2x8x8xf32>
      %43 = math.exp %42 : vector<2x8x8xf32>
      %c0_22 = arith.constant 0 : index
      %c0_23 = arith.constant 0 : index
      %c0_24 = arith.constant 0 : index
      %44 = vector.load %arg8[%c0_22, %c0_23, %c0_24] : memref<2x8x1xf32, #tpu.memory_space<vmem>>, vector<2x8x1xf32>
      %45 = arith.mulf %40, %44 : vector<2x8x1xf32>
      %cst_25 = arith.constant dense<0.000000e+00> : vector<2x8xf32>
      %46 = vector.multi_reduction <add>, %43, %cst_25 [2] : vector<2x8x8xf32> to vector<2x8xf32>
      %47 = vector.shape_cast %46 : vector<2x8xf32> to vector<2x8x1xf32>
      %48 = arith.addf %45, %47 : vector<2x8x1xf32>
      %c0_26 = arith.constant 0 : index
      %c0_27 = arith.constant 0 : index
      %c0_28 = arith.constant 0 : index
      %49 = vector.load %arg8[%c0_26, %c0_27, %c0_28] : memref<2x8x1xf32, #tpu.memory_space<vmem>>, vector<2x8x1xf32>
      tpu.vector_store %arg8[%c0_26, %c0_27, %c0_28], %48 {strides = array<i32>} : memref<2x8x1xf32, #tpu.memory_space<vmem>>, vector<2x8x1xf32>,
      %c0_29 = arith.constant 0 : index
      %c0_30 = arith.constant 0 : index
      %c0_31 = arith.constant 0 : index
      %50 = vector.load %arg9[%c0_29, %c0_30, %c0_31] : memref<2x8x8xf32, #tpu.memory_space<vmem>>, vector<2x8x8xf32>
      %51 = vector.broadcast %40 : vector<2x8x1xf32> to vector<2x8x8xf32>
      %52 = arith.mulf %51, %50 : vector<2x8x8xf32>
      %53 = arith.truncf %43 : vector<2x8x8xf32> to vector<2x8x8xbf16>
      "tpu.trace_start"() <{level = 10 : i32, message = "rqk,kd->rqd"}> : () -> ()
      %cst_32 = arith.constant dense<0.000000e+00> : vector<2x8x8xf32>
      %54 = tpu.matmul %53, %17, %cst_32 {dimension_numbers = #tpu.dot_dimension_numbers<[2], [0], [0, 1], [1], [0, 0, 0, 1, 1, 1], [], []>} : vector<2x8x8xbf16>, vector<8x8xbf16>, vector<2x8x8xf32> -> vector<2x8x8xf32>
      "tpu.trace_stop"() : () -> ()
      %55 = arith.addf %52, %54 : vector<2x8x8xf32>
      %c0_33 = arith.constant 0 : index
      %c0_34 = arith.constant 0 : index
      %c0_35 = arith.constant 0 : index
      %56 = vector.load %arg9[%c0_33, %c0_34, %c0_35] : memref<2x8x8xf32, #tpu.memory_space<vmem>>, vector<2x8x8xf32>
      tpu.vector_store %arg9[%c0_33, %c0_34, %c0_35], %55 {strides = array<i32>} : memref<2x8x8xf32, #tpu.memory_space<vmem>>, vector<2x8x8xf32>,
      %c0_36 = arith.constant 0 : index
      %c0_37 = arith.constant 0 : index
      %c0_38 = arith.constant 0 : index
      %57 = vector.load %arg7[%c0_36, %c0_37, %c0_38] : memref<2x8x1xf32, #tpu.memory_space<vmem>>, vector<2x8x1xf32>
      tpu.vector_store %arg7[%c0_36, %c0_37, %c0_38], %38 {strides = array<i32>} : memref<2x8x1xf32, #tpu.memory_space<vmem>>, vector<2x8x1xf32>,
    } else {
    }
    %c0_i32_3 = arith.constant 0 : i32
    %9 = arith.cmpi eq, %arg2, %c0_i32_3 : i32
    %10 = arith.extui %9 : i1 to i32
    %c0_i32_4 = arith.constant 0 : i32
    %11 = arith.cmpi ne, %10, %c0_i32_4 : i32
    scf.if %11 {
      %c0 = arith.constant 0 : index
      %c0_5 = arith.constant 0 : index
      %c0_6 = arith.constant 0 : index
      %12 = vector.load %arg8[%c0, %c0_5, %c0_6] : memref<2x8x1xf32, #tpu.memory_space<vmem>>, vector<2x8x1xf32>
      %13 = tpu.reciprocal %12 {approx = true} : vector<2x8x1xf32> -> vector<2x8x1xf32>
      %c0_7 = arith.constant 0 : index
      %c0_8 = arith.constant 0 : index
      %c0_9 = arith.constant 0 : index
      %14 = vector.load %arg9[%c0_7, %c0_8, %c0_9] : memref<2x8x8xf32, #tpu.memory_space<vmem>>, vector<2x8x8xf32>
      %15 = vector.broadcast %13 : vector<2x8x1xf32> to vector<2x8x8xf32>
      %16 = arith.mulf %14, %15 : vector<2x8x8xf32>
      %17 = arith.truncf %16 : vector<2x8x8xf32> to vector<2x8x8xbf16>
      %c0_10 = arith.constant 0 : index
      %c0_11 = arith.constant 0 : index
      %c0_12 = arith.constant 0 : index
      %c0_13 = arith.constant 0 : index
      %18 = vector.load %arg6[%c0_10, %c0_11, %c0_12, %c0_13] : memref<1x2x8x8xbf16, #tpu.memory_space<vmem>>, vector<1x2x8x8xbf16>
      %19 = vector.shape_cast %18 : vector<1x2x8x8xbf16> to vector<2x8x8xbf16>
      %20 = vector.shape_cast %17 : vector<2x8x8xbf16> to vector<1x2x8x8xbf16>
      tpu.vector_store %arg6[%c0_10, %c0_11, %c0_12, %c0_13], %20 {strides = array<i32>} : memref<1x2x8x8xbf16, #tpu.memory_space<vmem>>, vector<1x2x8x8xbf16>,
    } else {
    }
    return
  }
  func.func @transform_0(%arg0: i32, %arg1: i32, %arg2: i32) -> (i32, i32, i32, i32) {
    %c0_i32 = arith.constant 0 : i32
    %c0_i32_0 = arith.constant 0 : i32
    %c0_i32_1 = arith.constant 0 : i32
    return %arg0, %c0_i32, %arg1, %c0_i32_0 : i32, i32, i32, i32
  }
  func.func @transform_1(%arg0: i32, %arg1: i32, %arg2: i32) -> (i32, i32, i32) {
    %c0_i32 = arith.constant 0 : i32
    %c0_i32_0 = arith.constant 0 : i32
    return %arg0, %arg2, %c0_i32 : i32, i32, i32
  }
  func.func @transform_2(%arg0: i32, %arg1: i32, %arg2: i32) -> (i32, i32, i32) {
    %c0_i32 = arith.constant 0 : i32
    %c0_i32_0 = arith.constant 0 : i32
    return %arg0, %arg2, %c0_i32 : i32, i32, i32
  }
  func.func @transform_3(%arg0: i32, %arg1: i32, %arg2: i32) -> (i32, i32, i32, i32) {
    %c0_i32 = arith.constant 0 : i32
    %c0_i32_0 = arith.constant 0 : i32
    %c0_i32_1 = arith.constant 0 : i32
    return %arg0, %c0_i32, %arg1, %c0_i32_0 : i32, i32, i32, i32
  }
}

module attributes {stable_mosaic.version = 11 : i64} {
  func.func @_gate_kernel(%arg0: i32, %arg1: i32, %arg2: i32, %arg3: memref<8x32xbf16, #tpu.memory_space<vmem>>, %arg4: memref<32x64xbf16, #tpu.memory_space<vmem>>, %arg5: memref<32x64xbf16, #tpu.memory_space<vmem>>, %arg6: memref<8x64xbf16, #tpu.memory_space<vmem>>, %arg7: memref<8x64xf32, #tpu.memory_space<vmem>>, %arg8: memref<8x64xf32, #tpu.memory_space<vmem>>) attributes {dimension_semantics = [#tpu.dimension_semantics<parallel>, #tpu.dimension_semantics<parallel>, #tpu.dimension_semantics<arbitrary>], iteration_bounds = array<i64: 1, 1, 1>, scalar_prefetch = 0 : i64, scratch_operands = 2 : i64, tpu.core_type = #tpu.core_type<tc>, window_params = [{transform_indices = @transform_0, window_bounds = array<i64: 8, 32>}, {transform_indices = @transform_1, window_bounds = array<i64: 32, 64>}, {transform_indices = @transform_2, window_bounds = array<i64: 32, 64>}, {transform_indices = @transform_3, window_bounds = array<i64: 8, 64>}]} {
    %c0_i32 = arith.constant 0 : i32
    %0 = arith.cmpi eq, %arg2, %c0_i32 : i32
    %1 = arith.extui %0 : i1 to i32
    %c0_i32_0 = arith.constant 0 : i32
    %2 = arith.cmpi ne, %1, %c0_i32_0 : i32
    scf.if %2 {
      %cst_17 = arith.constant 0.000000e+00 : f32
      %17 = vector.broadcast %cst_17 : f32 to vector<8x64xf32>
      %c0_18 = arith.constant 0 : index
      %c0_19 = arith.constant 0 : index
      %18 = vector.load %arg7[%c0_18, %c0_19] : memref<8x64xf32, #tpu.memory_space<vmem>>, vector<8x64xf32>
      tpu.vector_store %arg7[%c0_18, %c0_19], %17 {strides = array<i32>} : memref<8x64xf32, #tpu.memory_space<vmem>>, vector<8x64xf32>,
      %cst_20 = arith.constant 0.000000e+00 : f32
      %19 = vector.broadcast %cst_20 : f32 to vector<8x64xf32>
      %c0_21 = arith.constant 0 : index
      %c0_22 = arith.constant 0 : index
      %20 = vector.load %arg8[%c0_21, %c0_22] : memref<8x64xf32, #tpu.memory_space<vmem>>, vector<8x64xf32>
      tpu.vector_store %arg8[%c0_21, %c0_22], %19 {strides = array<i32>} : memref<8x64xf32, #tpu.memory_space<vmem>>, vector<8x64xf32>,
    } else {
    }
    %c0 = arith.constant 0 : index
    %c0_1 = arith.constant 0 : index
    %3 = vector.load %arg3[%c0, %c0_1] : memref<8x32xbf16, #tpu.memory_space<vmem>>, vector<8x32xbf16>
    %c0_2 = arith.constant 0 : index
    %c0_3 = arith.constant 0 : index
    %4 = vector.load %arg7[%c0_2, %c0_3] : memref<8x64xf32, #tpu.memory_space<vmem>>, vector<8x64xf32>
    %c0_4 = arith.constant 0 : index
    %c0_5 = arith.constant 0 : index
    %5 = vector.load %arg4[%c0_4, %c0_5] : memref<32x64xbf16, #tpu.memory_space<vmem>>, vector<32x64xbf16>
    %cst = arith.constant dense<0.000000e+00> : vector<8x64xf32>
    %6 = tpu.matmul %3, %5, %cst {dimension_numbers = #tpu.dot_dimension_numbers<[1], [0], [0], [1], [0, 0, 1, 1], [], []>} : vector<8x32xbf16>, vector<32x64xbf16>, vector<8x64xf32> -> vector<8x64xf32>
    %7 = arith.addf %4, %6 : vector<8x64xf32>
    %c0_6 = arith.constant 0 : index
    %c0_7 = arith.constant 0 : index
    %8 = vector.load %arg7[%c0_6, %c0_7] : memref<8x64xf32, #tpu.memory_space<vmem>>, vector<8x64xf32>
    tpu.vector_store %arg7[%c0_6, %c0_7], %7 {strides = array<i32>} : memref<8x64xf32, #tpu.memory_space<vmem>>, vector<8x64xf32>,
    %c0_8 = arith.constant 0 : index
    %c0_9 = arith.constant 0 : index
    %9 = vector.load %arg8[%c0_8, %c0_9] : memref<8x64xf32, #tpu.memory_space<vmem>>, vector<8x64xf32>
    %c0_10 = arith.constant 0 : index
    %c0_11 = arith.constant 0 : index
    %10 = vector.load %arg5[%c0_10, %c0_11] : memref<32x64xbf16, #tpu.memory_space<vmem>>, vector<32x64xbf16>
    %cst_12 = arith.constant dense<0.000000e+00> : vector<8x64xf32>
    %11 = tpu.matmul %3, %10, %cst_12 {dimension_numbers = #tpu.dot_dimension_numbers<[1], [0], [0], [1], [0, 0, 1, 1], [], []>} : vector<8x32xbf16>, vector<32x64xbf16>, vector<8x64xf32> -> vector<8x64xf32>
    %12 = arith.addf %9, %11 : vector<8x64xf32>
    %c0_13 = arith.constant 0 : index
    %c0_14 = arith.constant 0 : index
    %13 = vector.load %arg8[%c0_13, %c0_14] : memref<8x64xf32, #tpu.memory_space<vmem>>, vector<8x64xf32>
    tpu.vector_store %arg8[%c0_13, %c0_14], %12 {strides = array<i32>} : memref<8x64xf32, #tpu.memory_space<vmem>>, vector<8x64xf32>,
    %c0_i32_15 = arith.constant 0 : i32
    %14 = arith.cmpi eq, %arg2, %c0_i32_15 : i32
    %15 = arith.extui %14 : i1 to i32
    %c0_i32_16 = arith.constant 0 : i32
    %16 = arith.cmpi ne, %15, %c0_i32_16 : i32
    scf.if %16 {
      %c0_17 = arith.constant 0 : index
      %c0_18 = arith.constant 0 : index
      %17 = vector.load %arg7[%c0_17, %c0_18] : memref<8x64xf32, #tpu.memory_space<vmem>>, vector<8x64xf32>
      %18 = arith.negf %17 : vector<8x64xf32>
      %19 = math.exp %18 : vector<8x64xf32>
      %cst_19 = arith.constant 1.000000e+00 : f32
      %20 = vector.broadcast %cst_19 : f32 to vector<8x64xf32>
      %21 = arith.addf %20, %19 : vector<8x64xf32>
      %22 = arith.divf %20, %21 : vector<8x64xf32>
      %23 = arith.mulf %17, %22 : vector<8x64xf32>
      %c0_20 = arith.constant 0 : index
      %c0_21 = arith.constant 0 : index
      %24 = vector.load %arg8[%c0_20, %c0_21] : memref<8x64xf32, #tpu.memory_space<vmem>>, vector<8x64xf32>
      %25 = arith.mulf %23, %24 : vector<8x64xf32>
      %26 = arith.truncf %25 : vector<8x64xf32> to vector<8x64xbf16>
      %c0_22 = arith.constant 0 : index
      %c0_23 = arith.constant 0 : index
      %27 = vector.load %arg6[%c0_22, %c0_23] : memref<8x64xbf16, #tpu.memory_space<vmem>>, vector<8x64xbf16>
      tpu.vector_store %arg6[%c0_22, %c0_23], %26 {strides = array<i32>} : memref<8x64xbf16, #tpu.memory_space<vmem>>, vector<8x64xbf16>,
    } else {
    }
    return
  }
  func.func @transform_0(%arg0: i32, %arg1: i32, %arg2: i32) -> (i32, i32) {
    %c0_i32 = arith.constant 0 : i32
    return %arg0, %arg2 : i32, i32
  }
  func.func @transform_1(%arg0: i32, %arg1: i32, %arg2: i32) -> (i32, i32) {
    %c0_i32 = arith.constant 0 : i32
    return %arg2, %arg1 : i32, i32
  }
  func.func @transform_2(%arg0: i32, %arg1: i32, %arg2: i32) -> (i32, i32) {
    %c0_i32 = arith.constant 0 : i32
    return %arg2, %arg1 : i32, i32
  }
  func.func @transform_3(%arg0: i32, %arg1: i32, %arg2: i32) -> (i32, i32) {
    %c0_i32 = arith.constant 0 : i32
    return %arg0, %arg1 : i32, i32
  }
}

module attributes {stable_mosaic.version = 11 : i64} {
  func.func @_matmul_res_kernel(%arg0: i32, %arg1: i32, %arg2: i32, %arg3: memref<8x32xbf16, #tpu.memory_space<vmem>>, %arg4: memref<32x32xbf16, #tpu.memory_space<vmem>>, %arg5: memref<8x32xbf16, #tpu.memory_space<vmem>>, %arg6: memref<8x32xbf16, #tpu.memory_space<vmem>>, %arg7: memref<8x32xf32, #tpu.memory_space<vmem>>) attributes {dimension_semantics = [#tpu.dimension_semantics<parallel>, #tpu.dimension_semantics<parallel>, #tpu.dimension_semantics<arbitrary>], iteration_bounds = array<i64: 1, 1, 1>, scalar_prefetch = 0 : i64, scratch_operands = 1 : i64, tpu.core_type = #tpu.core_type<tc>, window_params = [{transform_indices = @transform_0, window_bounds = array<i64: 8, 32>}, {transform_indices = @transform_1, window_bounds = array<i64: 32, 32>}, {transform_indices = @transform_2, window_bounds = array<i64: 8, 32>}, {transform_indices = @transform_3, window_bounds = array<i64: 8, 32>}]} {
    %c0_i32 = arith.constant 0 : i32
    %0 = arith.cmpi eq, %arg2, %c0_i32 : i32
    %1 = arith.extui %0 : i1 to i32
    %c0_i32_0 = arith.constant 0 : i32
    %2 = arith.cmpi ne, %1, %c0_i32_0 : i32
    scf.if %2 {
      %cst_10 = arith.constant 0.000000e+00 : f32
      %12 = vector.broadcast %cst_10 : f32 to vector<8x32xf32>
      %c0_11 = arith.constant 0 : index
      %c0_12 = arith.constant 0 : index
      %13 = vector.load %arg7[%c0_11, %c0_12] : memref<8x32xf32, #tpu.memory_space<vmem>>, vector<8x32xf32>
      tpu.vector_store %arg7[%c0_11, %c0_12], %12 {strides = array<i32>} : memref<8x32xf32, #tpu.memory_space<vmem>>, vector<8x32xf32>,
    } else {
    }
    %c0 = arith.constant 0 : index
    %c0_1 = arith.constant 0 : index
    %3 = vector.load %arg7[%c0, %c0_1] : memref<8x32xf32, #tpu.memory_space<vmem>>, vector<8x32xf32>
    %c0_2 = arith.constant 0 : index
    %c0_3 = arith.constant 0 : index
    %4 = vector.load %arg3[%c0_2, %c0_3] : memref<8x32xbf16, #tpu.memory_space<vmem>>, vector<8x32xbf16>
    %c0_4 = arith.constant 0 : index
    %c0_5 = arith.constant 0 : index
    %5 = vector.load %arg4[%c0_4, %c0_5] : memref<32x32xbf16, #tpu.memory_space<vmem>>, vector<32x32xbf16>
    %cst = arith.constant dense<0.000000e+00> : vector<8x32xf32>
    %6 = tpu.matmul %4, %5, %cst {dimension_numbers = #tpu.dot_dimension_numbers<[1], [0], [0], [1], [0, 0, 1, 1], [], []>} : vector<8x32xbf16>, vector<32x32xbf16>, vector<8x32xf32> -> vector<8x32xf32>
    %7 = arith.addf %3, %6 : vector<8x32xf32>
    %c0_6 = arith.constant 0 : index
    %c0_7 = arith.constant 0 : index
    %8 = vector.load %arg7[%c0_6, %c0_7] : memref<8x32xf32, #tpu.memory_space<vmem>>, vector<8x32xf32>
    tpu.vector_store %arg7[%c0_6, %c0_7], %7 {strides = array<i32>} : memref<8x32xf32, #tpu.memory_space<vmem>>, vector<8x32xf32>,
    %c0_i32_8 = arith.constant 0 : i32
    %9 = arith.cmpi eq, %arg2, %c0_i32_8 : i32
    %10 = arith.extui %9 : i1 to i32
    %c0_i32_9 = arith.constant 0 : i32
    %11 = arith.cmpi ne, %10, %c0_i32_9 : i32
    scf.if %11 {
      %c0_10 = arith.constant 0 : index
      %c0_11 = arith.constant 0 : index
      %12 = vector.load %arg7[%c0_10, %c0_11] : memref<8x32xf32, #tpu.memory_space<vmem>>, vector<8x32xf32>
      %c0_12 = arith.constant 0 : index
      %c0_13 = arith.constant 0 : index
      %13 = vector.load %arg5[%c0_12, %c0_13] : memref<8x32xbf16, #tpu.memory_space<vmem>>, vector<8x32xbf16>
      %14 = arith.extf %13 : vector<8x32xbf16> to vector<8x32xf32>
      %15 = arith.addf %12, %14 : vector<8x32xf32>
      %16 = arith.truncf %15 : vector<8x32xf32> to vector<8x32xbf16>
      %c0_14 = arith.constant 0 : index
      %c0_15 = arith.constant 0 : index
      %17 = vector.load %arg6[%c0_14, %c0_15] : memref<8x32xbf16, #tpu.memory_space<vmem>>, vector<8x32xbf16>
      tpu.vector_store %arg6[%c0_14, %c0_15], %16 {strides = array<i32>} : memref<8x32xbf16, #tpu.memory_space<vmem>>, vector<8x32xbf16>,
    } else {
    }
    return
  }
  func.func @transform_0(%arg0: i32, %arg1: i32, %arg2: i32) -> (i32, i32) {
    %c0_i32 = arith.constant 0 : i32
    return %arg0, %arg2 : i32, i32
  }
  func.func @transform_1(%arg0: i32, %arg1: i32, %arg2: i32) -> (i32, i32) {
    %c0_i32 = arith.constant 0 : i32
    return %arg2, %arg1 : i32, i32
  }
  func.func @transform_2(%arg0: i32, %arg1: i32, %arg2: i32) -> (i32, i32) {
    %c0_i32 = arith.constant 0 : i32
    return %arg0, %arg1 : i32, i32
  }
  func.func @transform_3(%arg0: i32, %arg1: i32, %arg2: i32) -> (i32, i32) {
    %c0_i32 = arith.constant 0 : i32
    return %arg0, %arg1 : i32, i32
  }
}

module attributes {stable_mosaic.version = 11 : i64} {
  func.func @_matmul_kernel(%arg0: i32, %arg1: i32, %arg2: i32, %arg3: memref<8x32xbf16, #tpu.memory_space<vmem>>, %arg4: memref<32x64xbf16, #tpu.memory_space<vmem>>, %arg5: memref<8x64xf32, #tpu.memory_space<vmem>>, %arg6: memref<8x64xf32, #tpu.memory_space<vmem>>) attributes {dimension_semantics = [#tpu.dimension_semantics<parallel>, #tpu.dimension_semantics<parallel>, #tpu.dimension_semantics<arbitrary>], iteration_bounds = array<i64: 1, 1, 1>, scalar_prefetch = 0 : i64, scratch_operands = 1 : i64, tpu.core_type = #tpu.core_type<tc>, window_params = [{transform_indices = @transform_0, window_bounds = array<i64: 8, 32>}, {transform_indices = @transform_1, window_bounds = array<i64: 32, 64>}, {transform_indices = @transform_2, window_bounds = array<i64: 8, 64>}]} {
    %c0_i32 = arith.constant 0 : i32
    %0 = arith.cmpi eq, %arg2, %c0_i32 : i32
    %1 = arith.extui %0 : i1 to i32
    %c0_i32_0 = arith.constant 0 : i32
    %2 = arith.cmpi ne, %1, %c0_i32_0 : i32
    scf.if %2 {
      %cst_10 = arith.constant 0.000000e+00 : f32
      %12 = vector.broadcast %cst_10 : f32 to vector<8x64xf32>
      %c0_11 = arith.constant 0 : index
      %c0_12 = arith.constant 0 : index
      %13 = vector.load %arg6[%c0_11, %c0_12] : memref<8x64xf32, #tpu.memory_space<vmem>>, vector<8x64xf32>
      tpu.vector_store %arg6[%c0_11, %c0_12], %12 {strides = array<i32>} : memref<8x64xf32, #tpu.memory_space<vmem>>, vector<8x64xf32>,
    } else {
    }
    %c0 = arith.constant 0 : index
    %c0_1 = arith.constant 0 : index
    %3 = vector.load %arg6[%c0, %c0_1] : memref<8x64xf32, #tpu.memory_space<vmem>>, vector<8x64xf32>
    %c0_2 = arith.constant 0 : index
    %c0_3 = arith.constant 0 : index
    %4 = vector.load %arg3[%c0_2, %c0_3] : memref<8x32xbf16, #tpu.memory_space<vmem>>, vector<8x32xbf16>
    %c0_4 = arith.constant 0 : index
    %c0_5 = arith.constant 0 : index
    %5 = vector.load %arg4[%c0_4, %c0_5] : memref<32x64xbf16, #tpu.memory_space<vmem>>, vector<32x64xbf16>
    %cst = arith.constant dense<0.000000e+00> : vector<8x64xf32>
    %6 = tpu.matmul %4, %5, %cst {dimension_numbers = #tpu.dot_dimension_numbers<[1], [0], [0], [1], [0, 0, 1, 1], [], []>} : vector<8x32xbf16>, vector<32x64xbf16>, vector<8x64xf32> -> vector<8x64xf32>
    %7 = arith.addf %3, %6 : vector<8x64xf32>
    %c0_6 = arith.constant 0 : index
    %c0_7 = arith.constant 0 : index
    %8 = vector.load %arg6[%c0_6, %c0_7] : memref<8x64xf32, #tpu.memory_space<vmem>>, vector<8x64xf32>
    tpu.vector_store %arg6[%c0_6, %c0_7], %7 {strides = array<i32>} : memref<8x64xf32, #tpu.memory_space<vmem>>, vector<8x64xf32>,
    %c0_i32_8 = arith.constant 0 : i32
    %9 = arith.cmpi eq, %arg2, %c0_i32_8 : i32
    %10 = arith.extui %9 : i1 to i32
    %c0_i32_9 = arith.constant 0 : i32
    %11 = arith.cmpi ne, %10, %c0_i32_9 : i32
    scf.if %11 {
      %c0_10 = arith.constant 0 : index
      %c0_11 = arith.constant 0 : index
      %12 = vector.load %arg6[%c0_10, %c0_11] : memref<8x64xf32, #tpu.memory_space<vmem>>, vector<8x64xf32>
      %c0_12 = arith.constant 0 : index
      %c0_13 = arith.constant 0 : index
      %13 = vector.load %arg5[%c0_12, %c0_13] : memref<8x64xf32, #tpu.memory_space<vmem>>, vector<8x64xf32>
      tpu.vector_store %arg5[%c0_12, %c0_13], %12 {strides = array<i32>} : memref<8x64xf32, #tpu.memory_space<vmem>>, vector<8x64xf32>,
    } else {
    }
    return
  }
  func.func @transform_0(%arg0: i32, %arg1: i32, %arg2: i32) -> (i32, i32) {
    %c0_i32 = arith.constant 0 : i32
    return %arg0, %arg2 : i32, i32
  }
  func.func @transform_1(%arg0: i32, %arg1: i32, %arg2: i32) -> (i32, i32) {
    %c0_i32 = arith.constant 0 : i32
    return %arg2, %arg1 : i32, i32
  }
  func.func @transform_2(%arg0: i32, %arg1: i32, %arg2: i32) -> (i32, i32) {
    %c0_i32 = arith.constant 0 : i32
    return %arg0, %arg1 : i32, i32
  }
}

module attributes {stable_mosaic.version = 11 : i64} {
  func.func @_matmul_res_kernel(%arg0: i32, %arg1: i32, %arg2: i32, %arg3: memref<8x64xbf16, #tpu.memory_space<vmem>>, %arg4: memref<64x32xbf16, #tpu.memory_space<vmem>>, %arg5: memref<8x32xbf16, #tpu.memory_space<vmem>>, %arg6: memref<8x32xbf16, #tpu.memory_space<vmem>>, %arg7: memref<8x32xf32, #tpu.memory_space<vmem>>) attributes {dimension_semantics = [#tpu.dimension_semantics<parallel>, #tpu.dimension_semantics<parallel>, #tpu.dimension_semantics<arbitrary>], iteration_bounds = array<i64: 1, 1, 1>, scalar_prefetch = 0 : i64, scratch_operands = 1 : i64, tpu.core_type = #tpu.core_type<tc>, window_params = [{transform_indices = @transform_0, window_bounds = array<i64: 8, 64>}, {transform_indices = @transform_1, window_bounds = array<i64: 64, 32>}, {transform_indices = @transform_2, window_bounds = array<i64: 8, 32>}, {transform_indices = @transform_3, window_bounds = array<i64: 8, 32>}]} {
    %c0_i32 = arith.constant 0 : i32
    %0 = arith.cmpi eq, %arg2, %c0_i32 : i32
    %1 = arith.extui %0 : i1 to i32
    %c0_i32_0 = arith.constant 0 : i32
    %2 = arith.cmpi ne, %1, %c0_i32_0 : i32
    scf.if %2 {
      %cst_10 = arith.constant 0.000000e+00 : f32
      %12 = vector.broadcast %cst_10 : f32 to vector<8x32xf32>
      %c0_11 = arith.constant 0 : index
      %c0_12 = arith.constant 0 : index
      %13 = vector.load %arg7[%c0_11, %c0_12] : memref<8x32xf32, #tpu.memory_space<vmem>>, vector<8x32xf32>
      tpu.vector_store %arg7[%c0_11, %c0_12], %12 {strides = array<i32>} : memref<8x32xf32, #tpu.memory_space<vmem>>, vector<8x32xf32>,
    } else {
    }
    %c0 = arith.constant 0 : index
    %c0_1 = arith.constant 0 : index
    %3 = vector.load %arg7[%c0, %c0_1] : memref<8x32xf32, #tpu.memory_space<vmem>>, vector<8x32xf32>
    %c0_2 = arith.constant 0 : index
    %c0_3 = arith.constant 0 : index
    %4 = vector.load %arg3[%c0_2, %c0_3] : memref<8x64xbf16, #tpu.memory_space<vmem>>, vector<8x64xbf16>
    %c0_4 = arith.constant 0 : index
    %c0_5 = arith.constant 0 : index
    %5 = vector.load %arg4[%c0_4, %c0_5] : memref<64x32xbf16, #tpu.memory_space<vmem>>, vector<64x32xbf16>
    %cst = arith.constant dense<0.000000e+00> : vector<8x32xf32>
    %6 = tpu.matmul %4, %5, %cst {dimension_numbers = #tpu.dot_dimension_numbers<[1], [0], [0], [1], [0, 0, 1, 1], [], []>} : vector<8x64xbf16>, vector<64x32xbf16>, vector<8x32xf32> -> vector<8x32xf32>
    %7 = arith.addf %3, %6 : vector<8x32xf32>
    %c0_6 = arith.constant 0 : index
    %c0_7 = arith.constant 0 : index
    %8 = vector.load %arg7[%c0_6, %c0_7] : memref<8x32xf32, #tpu.memory_space<vmem>>, vector<8x32xf32>
    tpu.vector_store %arg7[%c0_6, %c0_7], %7 {strides = array<i32>} : memref<8x32xf32, #tpu.memory_space<vmem>>, vector<8x32xf32>,
    %c0_i32_8 = arith.constant 0 : i32
    %9 = arith.cmpi eq, %arg2, %c0_i32_8 : i32
    %10 = arith.extui %9 : i1 to i32
    %c0_i32_9 = arith.constant 0 : i32
    %11 = arith.cmpi ne, %10, %c0_i32_9 : i32
    scf.if %11 {
      %c0_10 = arith.constant 0 : index
      %c0_11 = arith.constant 0 : index
      %12 = vector.load %arg7[%c0_10, %c0_11] : memref<8x32xf32, #tpu.memory_space<vmem>>, vector<8x32xf32>
      %c0_12 = arith.constant 0 : index
      %c0_13 = arith.constant 0 : index
      %13 = vector.load %arg5[%c0_12, %c0_13] : memref<8x32xbf16, #tpu.memory_space<vmem>>, vector<8x32xbf16>
      %14 = arith.extf %13 : vector<8x32xbf16> to vector<8x32xf32>
      %15 = arith.addf %12, %14 : vector<8x32xf32>
      %16 = arith.truncf %15 : vector<8x32xf32> to vector<8x32xbf16>
      %c0_14 = arith.constant 0 : index
      %c0_15 = arith.constant 0 : index
      %17 = vector.load %arg6[%c0_14, %c0_15] : memref<8x32xbf16, #tpu.memory_space<vmem>>, vector<8x32xbf16>
      tpu.vector_store %arg6[%c0_14, %c0_15], %16 {strides = array<i32>} : memref<8x32xbf16, #tpu.memory_space<vmem>>, vector<8x32xbf16>,
    } else {
    }
    return
  }
  func.func @transform_0(%arg0: i32, %arg1: i32, %arg2: i32) -> (i32, i32) {
    %c0_i32 = arith.constant 0 : i32
    return %arg0, %arg2 : i32, i32
  }
  func.func @transform_1(%arg0: i32, %arg1: i32, %arg2: i32) -> (i32, i32) {
    %c0_i32 = arith.constant 0 : i32
    return %arg2, %arg1 : i32, i32
  }
  func.func @transform_2(%arg0: i32, %arg1: i32, %arg2: i32) -> (i32, i32) {
    %c0_i32 = arith.constant 0 : i32
    return %arg0, %arg1 : i32, i32
  }
  func.func @transform_3(%arg0: i32, %arg1: i32, %arg2: i32) -> (i32, i32) {
    %c0_i32 = arith.constant 0 : i32
    return %arg0, %arg1 : i32, i32
  }
}

</mosaic_0001>

<bundles_post_ra>
// kernel: closed_call.36
= control target key start
LH: loop header
LB: loop body
LE: loop exit
PB: predicated region body
PF: predicated region fallthrough
CT: control target
= control target key end

     0   :  { %vm14_vm0 = vcmask 261120   ;;  %v28_v7 = vlaneseq  ;;  %vm33_vm1 = vcmask 257024   ;;  %s65_s0 = inlined_call_operand.vmem [shape: bf16[8,32], index: 0, kind: input, shape index: {}]   ;;  %s66_s1 = inlined_call_operand.vmem [shape: bf16[1,32], index: 1, kind: input, shape index: {}]   ;;  %s67_s2 = inlined_call_operand.vmem [shape: bf16[8,32], index: 2, kind: output, shape index: {}]  }
   0x1   :  { %v11_v0 = vld [vmem:[%s65_s0] sm:$0xf] }
   0x2   :  { %v12_v1 = vunpack.c.l.bf16 %v11_v0  ;;  %v29_v8 = vshrl.u32 %v28_v7, 7  ;;  %v24_v9 = vld [vmem:[%s66_s1] sm:$0x1] }
   0x3   :  { %v26_v10 = vpack.i.b16 %v24_v9, %v24_v9 }
   0x4   :  { %v13_v2 = vmul.f32 %v12_v1, %v12_v1  ;;  %v30_v11 = vsub.s32 0, %v29_v8 }
   0x6   :  { %v15_v3 = vsel %vm14_vm0, %v13_v2, 0.0  ;;  %v31_v14 = vrot.slane %v26_v10, %v30_v11 }
   0x7   :  { %16 = vadd.xlane.f32.xlu0 %v15_v3 }
  0x90   :  { %v17_v4 = vpop.xlane.xlu0 %16 }
  0x91   :  { %v19_v5 = vmul.f32 0.03125, %v17_v4 }
  0x93   :  { %v20_v6 = vadd.f32 1e-05, %v19_v5 }
  0x95   :  { %39 = vrsqrt.f32 %v20_v6 }
  0xa2   :  { %v40_v12 = vpop.eup %39 }
  0xa3   :  { %v22_v13 = vmul.f32 %v40_v12, %v12_v1 }
  0xa5   :  { %v23_v15 = vpack.c.bf16 %v22_v13, %v22_v13 }
  0xa7   :  { %v32_v16 = vmul.bf16 %v31_v14, %v23_v15 }
  0xa9   :  { %34 = vst.msk [vmem:[%s67_s2] sm:$0xf] %vm33_vm1, %v32_v16 }

// kernel: closed_call.37
= control target key start
LH: loop header
LB: loop body
LE: loop exit
PB: predicated region body
PF: predicated region fallthrough
CT: control target
= control target key end

     0   :  { %vm16_vm0 = vcmask 523264   ;;  %v112_v0 = vmov 0.0   ;;  %vm113_vm1 = vmmov 0   ;;  %vm36_vm2 = vcmask 261120   ;;  %s143_s1 = inlined_call_operand.vmem [shape: bf16[32,64], index: 1, kind: input, shape index: {}]   ;;  %s144_s0 = inlined_call_operand.vmem [shape: bf16[8,32], index: 0, kind: input, shape index: {}]   ;;  %s145_s2 = inlined_call_operand.vmem [shape: bf16[8,64], index: 2, kind: output, shape index: {}]  }
   0x1   :  { %17 = vst.msk [vmem:[#allocation2] sm:$0xff] %vm16_vm0, %v112_v0  ;;  %100 = vmatprep.subr.bf16.mxu0 %v112_v0  ;;  %v110_v1 = vld [vmem:[%s143_s1 + $0x8] sm:$0xff]   ;;  %104 = vmatprep.mubr.msk.bf16.mxu0 %vm113_vm1, %v112_v0  ;;  %v111_v2 = vld [vmem:[%s143_s1] sm:$0xff]   ;;  %vm88_vm3 = vcmask 519168  }
   0x2   :  { %101 = vmatpush3.bf16.msra.mxu0 %v110_v1  ;;  %v19_v3 = vld [vmem:[%s144_s0] sm:$0xf] }
   0x3   :  { %102 = vmatprep.subr.bf16.mxu0 %v112_v0 }
   0x6   :  { %103 = vmatpush3.bf16.msra.mxu0 %v111_v2 }
   0x8   :  { %v18_v4 = vld [vmem:[#allocation2] sm:$0xff] }
   0x9   :  { %105 = vmatmul.mubr.msk.bf16.vlgmr.msra.gmra.mxu0 %vm36_vm2, %v19_v3 }
  0xc9   :  { %v74_v5 = vpop.f32.mrf.mxu0 }
  0xca   :  { %v80_v6 = vadd.f32 %v74_v5, %v18_v4 }
  0xcb   :  { %v106_v7 = vpop.f32.mrf.mxu0 }
  0xcc   :  { %82 = vst.msk [vmem:[#allocation2] sm:$0xff] %vm16_vm0, %v80_v6 }
  0xcd   :  { %v77_v8 = vpop.f32.mrf.mxu0 }
  0xcf   :  { %v107_v9 = vpop.f32.mrf.mxu0 }
  0xd3   :  { %v86_v10 = vld [vmem:[#allocation2] sm:$0xff] }
  0xd4   :  { %v87_v11 = vpack.c.bf16 %v86_v10, %v86_v10 }
  0xd6   :  { %89 = vst.msk [vmem:[%s145_s2] sm:$0xf] %vm88_vm3, %v87_v11 }

// kernel: closed_call.41
= control target key start
LH: loop header
LB: loop body
LE: loop exit
PB: predicated region body
PF: predicated region fallthrough
CT: control target
= control target key end

     0   :  { %vm19_vm0 = vcmask 523264   ;;  %v205_v0 = vmov 0.0   ;;  %vm206_vm1 = vmmov 0   ;;  %vm40_vm2 = vcmask 261120   ;;  %s249_s1 = inlined_call_operand.vmem [shape: bf16[32,64], index: 1, kind: input, shape index: {}]   ;;  %s250_s2 = inlined_call_operand.vmem [shape: bf16[32,64], index: 2, kind: input, shape index: {}]   ;;  %s251_s0 = inlined_call_operand.vmem [shape: bf16[8,32], index: 0, kind: input, shape index: {}]   ;;  %s252_s3 = inlined_call_operand.vmem [shape: bf16[8,64], index: 3, kind: output, shape index: {}]  }
   0x1   :  { %179 = vmatprep.subr.bf16.mxu0 %v205_v0  ;;  %v197_v1 = vld [vmem:[%s249_s1 + $0x8] sm:$0xff]   ;;  %183 = vmatprep.mubr.msk.bf16.mxu0 %vm206_vm1, %v205_v0  ;;  %20 = vst.msk [vmem:[#allocation2] sm:$0xff] %vm19_vm0, %v205_v0  ;;  %21 = vst.msk [vmem:[#allocation3] sm:$0xff] %vm19_vm0, %v205_v0  ;;  %v198_v2 = vld [vmem:[%s249_s1] sm:$0xff]   ;;  %vm160_vm3 = vcmask 519168  }
   0x2   :  { %187 = vmatprep.subr.bf16.mxu1 %v205_v0  ;;  %191 = vmatprep.mubr.msk.bf16.mxu1 %vm206_vm1, %v205_v0  ;;  %v199_v3 = vld [vmem:[%s250_s2 + $0x8] sm:$0xff]   ;;  %v200_v4 = vld [vmem:[%s250_s2] sm:$0xff]  }
   0x3   :  { %180 = vmatpush3.bf16.msra.mxu0 %v197_v1  ;;  %188 = vmatpush3.bf16.msra.mxu1 %v199_v3  ;;  %v22_v5 = vld [vmem:[%s251_s0] sm:$0xf] }
   0x4   :  { %181 = vmatprep.subr.bf16.mxu0 %v205_v0  ;;  %189 = vmatprep.subr.bf16.mxu1 %v205_v0 }
   0x7   :  { %182 = vmatpush3.bf16.msra.mxu0 %v198_v2  ;;  %190 = vmatpush3.bf16.msra.mxu1 %v200_v4 }
   0x8   :  { %v23_v6 = vld [vmem:[#allocation2] sm:$0xff]  ;;  %v87_v9 = vld [vmem:[#allocation3] sm:$0xff] }
   0xa   :  { %184 = vmatmul.mubr.msk.bf16.vlgmr.msra.gmra.mxu0 %vm40_vm2, %v22_v5  ;;  %192 = vmatmul.mubr.msk.bf16.vlgmr.msra.gmra.mxu1 %vm40_vm2, %v22_v5 }
  0xca   :  { %v78_v7 = vpop.f32.mrf.mxu0  ;;  %v138_v11 = vpop.f32.mrf.mxu1 }
  0xcb   :  { %v84_v8 = vadd.f32 %v78_v7, %v23_v6  ;;  %v144_v13 = vadd.f32 %v138_v11, %v87_v9 }
  0xcc   :  { %v185_v10 = vpop.f32.mrf.mxu0  ;;  %v193_v14 = vpop.f32.mrf.mxu1 }
  0xcd   :  { %86 = vst.msk [vmem:[#allocation2] sm:$0xff] %vm19_vm0, %v84_v8  ;;  %145 = vst.msk [vmem:[#allocation3] sm:$0xff] %vm19_vm0, %v144_v13 }
  0xce   :  { %v81_v12 = vpop.f32.mrf.mxu0  ;;  %v141_v16 = vpop.f32.mrf.mxu1 }
  0xd0   :  { %v186_v15 = vpop.f32.mrf.mxu0  ;;  %v194_v17 = vpop.f32.mrf.mxu1 }
  0xd4   :  { %v149_v18 = vld [vmem:[#allocation2] sm:$0xff]  ;;  %v157_v23 = vld [vmem:[#allocation3] sm:$0xff] }
  0xd5   :  { %v172_v19 = vmul.f32 -1.442695, %v149_v18 }
  0xd7   :  { %201 = vpow2.f32 %v172_v19 }
  0xe4   :  { %v202_v20 = vpop.eup %201 }
  0xe5   :  { %v153_v21 = vadd.f32 1.0, %v202_v20 }
  0xe7   :  { %203 = vrcp.f32 %v153_v21 }
  0xf4   :  { %v204_v22 = vpop.eup %203 }
  0xf5   :  { %v156_v24 = vmul.f32 %v204_v22, %v149_v18 }
  0xf7   :  { %v158_v25 = vmul.f32 %v157_v23, %v156_v24 }
  0xf9   :  { %v159_v26 = vpack.c.bf16 %v158_v25, %v158_v25 }
  0xfb   :  { %161 = vst.msk [vmem:[%s252_s3] sm:$0xf] %vm160_vm3, %v159_v26 }

// kernel: closed_call.39
= control target key start
LH: loop header
LB: loop body
LE: loop exit
PB: predicated region body
PF: predicated region fallthrough
CT: control target
= control target key end

     0   :  { %vm19_vm0 = vcmask 261120   ;;  %v117_v0 = vmov 0.0   ;;  %vm118_vm1 = vmmov 0   ;;  %vm93_vm2 = vcmask 257024   ;;  %s157_s1 = inlined_call_operand.vmem [shape: bf16[32,32], index: 1, kind: input, shape index: {}]   ;;  %s158_s0 = inlined_call_operand.vmem [shape: bf16[8,32], index: 0, kind: input, shape index: {}]   ;;  %s159_s2 = inlined_call_operand.vmem [shape: bf16[8,32], index: 2, kind: input, shape index: {}]   ;;  %s160_s3 = inlined_call_operand.vmem [shape: bf16[8,32], index: 3, kind: output, shape index: {}]  }
   0x1   :  { %105 = vmatprep.subr.bf16.mxu0 %v117_v0  ;;  %v115_v1 = vld [vmem:[%s157_s1 + $0x8] sm:$0xff]   ;;  %109 = vmatprep.mubr.msk.bf16.mxu0 %vm118_vm1, %v117_v0  ;;  %20 = vst.msk [vmem:[#allocation2] sm:$0xff] %vm19_vm0, %v117_v0  ;;  %v116_v2 = vld [vmem:[%s157_s1] sm:$0xff]  }
   0x2   :  { %106 = vmatpush3.bf16.msra.mxu0 %v115_v1  ;;  %v22_v3 = vld [vmem:[%s158_s0] sm:$0xf] }
   0x3   :  { %107 = vmatprep.subr.bf16.mxu0 %v117_v0  ;;  %v89_v8 = vld [vmem:[%s159_s2] sm:$0xf] }
   0x4   :  { %v90_v11 = vunpack.c.l.bf16 %v89_v8 }
   0x6   :  { %108 = vmatpush3.bf16.msra.mxu0 %v116_v2 }
   0x8   :  { %v21_v4 = vld [vmem:[#allocation2] sm:$0xff] }
   0x9   :  { %110 = vmatmul.mubr.msk.bf16.vlgmr.msra.gmra.mxu0 %vm19_vm0, %v22_v3 }
  0xc9   :  { %v77_v5 = vpop.f32.mrf.mxu0 }
  0xca   :  { %v83_v6 = vadd.f32 %v77_v5, %v21_v4 }
  0xcb   :  { %v111_v7 = vpop.f32.mrf.mxu0 }
  0xcc   :  { %84 = vst.msk [vmem:[#allocation2] sm:$0xff] %vm19_vm0, %v83_v6 }
  0xcd   :  { %v80_v9 = vpop.f32.mrf.mxu0 }
  0xcf   :  { %v112_v10 = vpop.f32.mrf.mxu0 }
  0xd3   :  { %v88_v12 = vld [vmem:[#allocation2] sm:$0xff] }
  0xd4   :  { %v91_v13 = vadd.f32 %v90_v11, %v88_v12 }
  0xd6   :  { %v92_v14 = vpack.c.bf16 %v91_v13, %v91_v13 }
  0xd8   :  { %94 = vst.msk [vmem:[%s160_s3] sm:$0xf] %vm93_vm2, %v92_v14 }

// kernel: transformer_forward.3
= control target key start
LH: loop header
LB: loop body
LE: loop exit
PB: predicated region body
PF: predicated region fallthrough
CT: control target
= control target key end

     0   :  { %v144_v1 = vmov 0.0   ;;  %vm145_vm0 = vmmov 0   ;;  %vm17_vm1 = vcmask 523264   ;;  %s177_s0 = inlined_call_operand.vmem [shape: bf16[8,32], index: 0, kind: input, shape index: {}]   ;;  %s178_s1 = inlined_call_operand.vmem [shape: bf16[32,64], index: 1, kind: input, shape index: {}]   ;;  %s179_s2 = inlined_call_operand.hbm [shape: f32[8,64], index: 2, kind: output, shape index: {}]  }
   0x1   :  { %v120_v0 = vld [vmem:[%s178_s1 + $0x8] sm:$0xff]   ;;  %109 = vmatprep.subr.bf16.mxu0 %v144_v1  ;;  %v121_v2 = vld [vmem:[%s178_s1] sm:$0xff]   ;;  %113 = vmatprep.mubr.msk.bf16.mxu0 %vm145_vm0, %v144_v1 }
   0x2   :  { %110 = vmatpush3.bf16.msra.mxu0 %v120_v0 }
   0x3   :  { %7 = vsyncpa [#allocation4], 0  ;;  %111 = vmatprep.subr.bf16.mxu0 %v144_v1  ;;  %18 = vst.msk [vmem:[#allocation2] sm:$0xff] %vm17_vm1, %v144_v1  ;;  %v20_v3 = vld [vmem:[%s177_s0] sm:$0xf]  ;;  %vm37_vm2 = vcmask 261120  }
   0x4   :  { %s146_s1 = smov [#allocation3]  }
   0x5   :  { %s95_s15 = sshll.u32 %s146_s1, 4  ;;  %s96_s15 = int_to_ptr.vmem [resolvable:$true] %s95_s15 }
   0x6   :  { %112 = vmatpush3.bf16.msra.mxu0 %v121_v2  ;;  %s122_s16 = scalar_lea.vmem %s96_s15, 128  ;;  %p127_p1 = scmp.lt.s32.totalorder %s96_s15, %s96_s15 }
   0x7   :  { %p123_p0 = scmp.ne.s32.totalorder %s96_s15, %s122_s16  ;;  %p128_p2 = scmp.lt.s32.totalorder %s122_s16, %s122_s16 }
   0x9   :  { %114 = vmatmul.mubr.msk.bf16.vlgmr.msra.gmra.mxu0 %vm37_vm2, %v20_v3  ;;  %p129_p3 = por %p128_p2, %p127_p1 }
   0xa   :  { %v19_v4 = vld [vmem:[#allocation2] sm:$0xff] }
   0xb   :  { %p130_p4 = pnand %p129_p3, %p123_p0 }
  0xc9   :  { %v75_v5 = vpop.f32.mrf.mxu0 }
  0xca   :  { %v81_v6 = vadd.f32 %v75_v5, %v19_v4 }
  0xcb   :  { %v115_v7 = vpop.f32.mrf.mxu0 }
  0xcc   :  { %83 = vst.msk [vmem:[#allocation2] sm:$0xff] %vm17_vm1, %v81_v6 }
  0xcd   :  { %v78_v8 = vpop.f32.mrf.mxu0 }
  0xcf   :  { %v116_v9 = vpop.f32.mrf.mxu0 }
  0xd3   :  { %v87_v10 = vld [vmem:[#allocation2] sm:$0xff] }
  0xd4   :  { %88 = vst.msk [vmem:[#allocation3] sm:$0xff] %vm17_vm1, %v87_v10 }
  0xd5   :  { %133 = shalt.err (!%p130_p4)
}
  0xd6   :  { %98 = dma.vmem_to_hbm [thread:$0]  %s96_s15, 128, %s179_s2, [#allocation4]  }
  0xd7   :  { %142 = dma.done.wait [#allocation4], 128  }
  0xd8   :  { %143 = vsyncadd [#allocation4], 4294967168 }
  0xd9   :  { %102 = vsyncpa [#allocation4], 1 }

// kernel: closed_call.38
= control target key start
LH: loop header
LB: loop body
LE: loop exit
PB: predicated region body
PF: predicated region fallthrough
CT: control target
= control target key end

     0   :  { %s748_s12 = smov 0   ;;  %s750_s13 = smov 0   ;;  %s818_s0 = inlined_call_operand.vmem [shape: bf16[2,2,8,8], index: 0, kind: input, shape index: {}]   ;;  %s819_s1 = inlined_call_operand.vmem [shape: bf16[2,8,8], index: 1, kind: input, shape index: {}]   ;;  %s820_s2 = inlined_call_operand.vmem [shape: bf16[2,8,8], index: 2, kind: input, shape index: {}]   ;;  %s821_s3 = inlined_call_operand.vmem [shape: bf16[2,2,8,8], index: 3, kind: output, shape index: {}]  }
   0x1   :  { %s752_s14 = smov 0  }
   0x2 LB: > { %s32_s15 = sadd.s32 1, %s718_s13  ;;  %p625_p0 = scmp.ge.s32.totalorder %s722_s14, 1  ;;  %s722_s14 = sphi %s752_s14, %s13_s14   ;;  %s718_s13 = sphi %s750_s13, %s823_s13   ;;  %s714_s12 = sphi %s748_s12, %s822_s12  }
   0x3   : > { %p34_p1 = scmp.ge.s32.totalorder %s32_s15, 2  ;;  %p191_p2 = scmp.lt.s32.totalorder %s722_s14, 3 }
   0x5   : > { %s825_s15 = smov (%p34_p1, %s32_s15), 0  ;;  %p192_p3 = pnand %p625_p0, %p191_p2 }
   0x6   : > { %p235_p4 = scmp.lt.s32.totalorder (!%p192_p3), %s714_s12, 1 }
   0x7   : > { %195 = sbr.rel (%p192_p3) target bundleno = 799 (0x31f), region = 32 }
   0xc   : > { %vm275_vm0 = vcmask 64512   ;;  %v724_v0 = vmov 0.0   ;;  %vm725_vm1 = vmmov 0   ;;  %s827_s12 = smov (!%p235_p4, %s714_s12), 1  ;;  %vm270_vm2 = vcmask 7168  }
   0xd   : > { %645 = vmatprep.subr.bf16.mxu0 %v724_v0  ;;  %276 = vst.msk [vmem:[#allocation4] sm:$0xff] %vm275_vm0, %v724_v0  ;;  %277 = vst.msk [vmem:[#allocation4 + $0x8] sm:$0xff] %vm275_vm0, %v724_v0  ;;  %647 = vmatprep.mubr.msk.bf16.mxu0 %vm725_vm1, %v724_v0  ;;  %s638_s16 = sshll.u32 %s827_s12, 3  ;;  %s628_s17 = sshll.u32 %s827_s12, 2  ;;  %v726_v4 = vmov -inf   ;;  %v344_v5 = vlaneseq  ;;  %v727_v18 = vmov 0  }
   0xe   : > { %651 = vmatprep.subr.bf16.mxu1 %v724_v0  ;;  %653 = vmatprep.mubr.msk.bf16.mxu1 %vm725_vm1, %v724_v0  ;;  %s242_s20 = scalar_lea.vmem %s818_s0, %s638_s16  ;;  %s249_s23 = scalar_lea.vmem %s819_s1, %s628_s17  ;;  %271 = vst.msk [vmem:[#allocation2] sm:$0xff] %vm270_vm2, %v726_v4  ;;  %272 = vst.msk [vmem:[#allocation2 + $0x8] sm:$0xff] %vm270_vm2, %v726_v4  ;;  %vm428_vm4 = vcmask 1043456   ;;  %vm502_vm5 = vcmask 60416  }
   0xf   : > { %v287_v1 = vld [vmem:[%s249_s23] sm:$0xf]  ;;  %273 = vst.msk [vmem:[#allocation3] sm:$0xff] %vm270_vm2, %v724_v0  ;;  %274 = vst.msk [vmem:[#allocation3 + $0x8] sm:$0xff] %vm270_vm2, %v724_v0  ;;  %v345_v6 = vshrl.u32 %v344_v5, 7  ;;  %v349_v7 = vand.u32 127, %v344_v5  ;;  %685 = vset.pattern.permute.xlu1 %v727_v18  ;;  %686 = vset.pattern.permute.xlu0 %v727_v18  ;;  %s256_s26 = scalar_lea.vmem %s820_s2, %s628_s17  ;;  %s264_s29 = scalar_lea.vmem %s821_s3, %s638_s16 }
  0x10   : > { %v299_v2 = vsel %vm275_vm0, %v287_v1, 0  ;;  %v687_v3 = vld [vmem:[%s242_s20] sm:$0xff]  }
  0x11   : > { %646 = vmatpush3.bf16.xpose.msra.mxu0 %v299_v2  ;;  %vm352_vm3 = vcmp.le.s32.totalorder %v349_v7, %v345_v6  ;;  %v288_v27 = vld [vmem:[%s256_s26] sm:$0xf] }
  0x12   : > { %v430_v28 = vsel %vm428_vm4, %v288_v27, 0 }
  0x13   : > { %652 = vmatpush3.bf16.msra.mxu1 %v430_v28 }
  0x14   : > { %v404_v56 = vld [vmem:[#allocation4] sm:$0xff]  ;;  %v405_v59 = vld [vmem:[#allocation4 + $0x8] sm:$0xff] }
  0x15   : > { %v357_v19 = vld [vmem:[#allocation2] sm:$0xff]  ;;  %v358_v22 = vld [vmem:[#allocation2 + $0x8] sm:$0xff] }
  0x16   : > { %v389_v44 = vld [vmem:[#allocation3] sm:$0xff]  ;;  %v390_v47 = vld [vmem:[#allocation3 + $0x8] sm:$0xff] }
  0x18   : > { %648 = vmatmul.mubr.msk.bf16.vlgmr.msra.gmra.mxu0 %vm275_vm0, %v687_v3 }
  0xd8   : > { %v335_v8 = vpop.f32.mrf.mxu0 }
  0xd9   : > { %v342_v9 = vmul.f32 0.35355338, %v335_v8 }
  0xda   : > { %v649_v10 = vpop.f32.mrf.mxu0 }
  0xdb   : > { %v355_v11 = vsel %vm352_vm3, %v342_v9, -1e+30 }
  0xdc   : > { %v338_v12 = vpop.f32.mrf.mxu0  ;;  %v359_v13 = vsel %vm275_vm0, %v355_v11, -inf }
  0xdd   : > { %v343_v14 = vmul.f32 0.35355338, %v338_v12  ;;  %360 = vmax.xlane.f32.xlu0 %v359_v13 }
  0xde   : > { %v650_v15 = vpop.f32.mrf.mxu0 }
  0xdf   : > { %v356_v16 = vsel %vm352_vm3, %v343_v14, -1e+30 }
  0xe0   : > { %v362_v17 = vsel %vm275_vm0, %v356_v16, -inf }
  0xe1   : > { %363 = vmax.xlane.f32.xlu0 %v362_v17 }
 0x166   : > { %v361_v20 = vpop.xlane.xlu0 %360 }
 0x167   : > { %v365_v21 = vmax.f32 %v357_v19, %v361_v20 }
 0x169   : > { %v367_v23 = vsub.f32 %v357_v19, %v365_v21  ;;  %477 = vst.msk [vmem:[#allocation2] sm:$0xff] %vm270_vm2, %v365_v21  ;;  %375 = vperm.xlu1 %685, %v365_v21  }
 0x16a   : > { %v364_v24 = vpop.xlane.xlu0 %363 }
 0x16b   : > { %v366_v25 = vmax.f32 %v358_v22, %v364_v24  ;;  %v369_v41 = vmul.f32 1.442695, %v367_v23 }
 0x16d   : > { %v368_v26 = vsub.f32 %v358_v22, %v366_v25  ;;  %478 = vst.msk [vmem:[#allocation2 + $0x8] sm:$0xff] %vm270_vm2, %v366_v25  ;;  %380 = vperm.xlu1 %685, %v366_v25  }
 0x16f   : > { %v371_v38 = vmul.f32 1.442695, %v368_v26 }
 0x1e4   : > { %v376_v29 = vpop.permute.xlu1 %375 }
 0x1e5   : > { %v383_v30 = vsub.f32 %v355_v11, %v376_v29 }
 0x1e7   : > { %v385_v31 = vmul.f32 1.442695, %v383_v30 }
 0x1e8   : > { %v381_v32 = vpop.permute.xlu1 %380 }
 0x1e9   : > { %688 = vpow2.f32 %v385_v31  ;;  %v384_v33 = vsub.f32 %v356_v16, %v381_v32 }
 0x1eb   : > { %v387_v34 = vmul.f32 1.442695, %v384_v33 }
 0x1ed   : > { %690 = vpow2.f32 %v387_v34 }
 0x1ee   : > { %692 = vpow2.f32 %v371_v38 }
 0x1ef   : > { %694 = vpow2.f32 %v369_v41 }
 0x1f6   : > { %v689_v35 = vpop.eup %688 }
 0x1f7   : > { %v393_v36 = vsel %vm275_vm0, %v689_v35, 0.0 }
 0x1f8   : > { %394 = vadd.xlane.f32.xlu0 %v393_v36 }
 0x1fa   : > { %v691_v37 = vpop.eup %690 }
 0x1fb   : > { %v396_v39 = vsel %vm275_vm0, %v691_v37, 0.0  ;;  %v640_v40 = vpack.c.bf16 %v691_v37, %v689_v35  ;;  %v693_v42 = vpop.eup %692 }
 0x1fc   : > { %397 = vadd.xlane.f32.xlu1 %v396_v39  ;;  %v695_v43 = vpop.eup %694  ;;  %v392_v49 = vmul.f32 %v693_v42, %v390_v47 }
 0x1fd   : > { %654 = vmatmul.mubr.msk.bf16.vlgmr.msra.gmra.mxu1 %vm275_vm0, %v640_v40  ;;  %v391_v45 = vmul.f32 %v695_v43, %v389_v44 }
 0x20d   : > { %413 = vperm.xlu1 %685, %v693_v42  }
 0x20e   : > { %408 = vperm.xlu0 %686, %v695_v43  }
 0x281   : > { %v395_v46 = vpop.xlane.xlu0 %394 }
 0x282   : > { %v399_v48 = vadd.f32 %v395_v46, %v391_v45 }
 0x284   : > { %402 = vst.msk [vmem:[#allocation3] sm:$0xff] %vm270_vm2, %v399_v48 }
 0x285   : > { %v398_v50 = vpop.xlane.xlu1 %397 }
 0x286   : > { %v400_v51 = vadd.f32 %v398_v50, %v392_v49 }
 0x288   : > { %403 = vst.msk [vmem:[#allocation3 + $0x8] sm:$0xff] %vm270_vm2, %v400_v51 }
 0x289   : > { %v409_v57 = vpop.permute.xlu0 %408  ;;  %v414_v60 = vpop.permute.xlu1 %413 }
 0x28a   : > { %v416_v58 = vmul.f32 %v409_v57, %v404_v56  ;;  %v417_v0 = vmul.f32 %v414_v60, %v405_v59 }
 0x28b   : > { %v482_v52 = vld [vmem:[#allocation3] sm:$0xff] }
 0x28c   : > { %696 = vrcp.f32 %v482_v52 }
 0x28f   : > { %v483_v53 = vld [vmem:[#allocation3 + $0x8] sm:$0xff] }
 0x290   : > { %698 = vrcp.f32 %v483_v53 }
 0x299   : > { %v697_v54 = vpop.eup %696 }
 0x29a   : > { %490 = vperm.xlu0 %686, %v697_v54  }
 0x29d   : > { %v699_v55 = vpop.eup %698 }
 0x29e   : > { %495 = vperm.xlu0 %686, %v699_v55  }
 0x2bd   : > { %v466_v61 = vpop.f32.mrf.mxu1 }
 0x2be   : > { %v473_v62 = vadd.f32 %v466_v61, %v416_v58 }
 0x2bf   : > { %v655_v63 = vpop.f32.mrf.mxu1 }
 0x2c0   : > { %475 = vst.msk [vmem:[#allocation4] sm:$0xff] %vm275_vm0, %v473_v62 }
 0x2c1   : > { %v469_v1 = vpop.f32.mrf.mxu1 }
 0x2c2   : > { %v474_v2 = vadd.f32 %v469_v1, %v417_v0 }
 0x2c3   : > { %v656_v3 = vpop.f32.mrf.mxu1 }
 0x2c4   : > { %476 = vst.msk [vmem:[#allocation4 + $0x8] sm:$0xff] %vm275_vm0, %v474_v2 }
 0x2c7   : > { %v486_v4 = vld [vmem:[#allocation4] sm:$0xff] }
 0x2cb   : > { %v487_v8 = vld [vmem:[#allocation4 + $0x8] sm:$0xff] }
 0x315   : > { %v491_v5 = vpop.permute.xlu0 %490 }
 0x316   : > { %v498_v6 = vmul.f32 %v491_v5, %v486_v4 }
 0x318   : > { %v500_v7 = vpack.c.bf16 %v498_v6, %v498_v6 }
 0x319   : > { %v496_v9 = vpop.permute.xlu0 %495 }
 0x31a   : > { %503 = vst.msk [vmem:[%s264_s29] sm:$0xf] %vm502_vm5, %v500_v7  ;;  %v499_v10 = vmul.f32 %v496_v9, %v487_v8 }
 0x31c   : > { %v501_v11 = vpack.c.bf16 %v499_v10, %v499_v10 }
 0x31e   : > { %504 = vst.msk [vmem:[%s264_s29 + $0x4] sm:$0xf] %vm502_vm5, %v501_v11 }
 0x31f PF: > { %s13_s14 = sadd.s32 1, %s722_s14   ;;  %s822_s12 = smov %s718_s13 }
 0x320   : > { %p10_p5 = scmp.ge.s32.totalorder %s13_s14, 4   ;;  %s823_s13 = smov %s825_s15 }
 0x322   :  { %12 = sbr.rel (!%p10_p5) target bundleno = 2 (0x2), region = 80 }

// kernel: closed_call.42
= control target key start
LH: loop header
LB: loop body
LE: loop exit
PB: predicated region body
PF: predicated region fallthrough
CT: control target
= control target key end

     0   :  { %vm19_vm0 = vcmask 261120   ;;  %v144_v0 = vmov 0.0   ;;  %vm145_vm1 = vmmov 0   ;;  %vm55_vm2 = vcmask 523264   ;;  %s189_s1 = inlined_call_operand.vmem [shape: bf16[64,32], index: 1, kind: input, shape index: {}]   ;;  %s190_s0 = inlined_call_operand.vmem [shape: bf16[8,64], index: 0, kind: input, shape index: {}]   ;;  %s191_s2 = inlined_call_operand.vmem [shape: bf16[8,32], index: 2, kind: input, shape index: {}]   ;;  %s192_s3 = inlined_call_operand.vmem [shape: bf16[8,32], index: 3, kind: output, shape index: {}]  }
   0x1   :  { %126 = vmatprep.subr.bf16.mxu0 %v144_v0  ;;  %v140_v1 = vld [vmem:[%s189_s1 + $0x18] sm:$0xff]   ;;  %134 = vmatprep.mubr.msk.bf16.mxu0 %vm145_vm1, %v144_v0  ;;  %20 = vst.msk [vmem:[#allocation2] sm:$0xff] %vm19_vm0, %v144_v0  ;;  %v141_v2 = vld [vmem:[%s189_s1 + $0x10] sm:$0xff]   ;;  %v142_v3 = vld [vmem:[%s189_s1 + $0x8] sm:$0xff]   ;;  %vm110_vm3 = vcmask 257024  }
   0x2   :  { %127 = vmatpush3.bf16.msra.mxu0 %v140_v1  ;;  %v143_v4 = vld [vmem:[%s189_s1] sm:$0xff]  }
   0x3   :  { %128 = vmatprep.subr.bf16.mxu0 %v144_v0  ;;  %v22_v5 = vld [vmem:[%s190_s0] sm:$0xf] }
   0x4   :  { %v106_v10 = vld [vmem:[%s191_s2] sm:$0xf] }
   0x5   :  { %v107_v13 = vunpack.c.l.bf16 %v106_v10 }
   0x6   :  { %129 = vmatpush3.bf16.msra.mxu0 %v141_v2 }
   0x7   :  { %130 = vmatprep.subr.bf16.mxu0 %v144_v0 }
   0x8   :  { %v21_v6 = vld [vmem:[#allocation2] sm:$0xff] }
   0xa   :  { %131 = vmatpush3.bf16.msra.mxu0 %v142_v3 }
   0xb   :  { %132 = vmatprep.subr.bf16.mxu0 %v144_v0 }
   0xe   :  { %133 = vmatpush3.bf16.msra.mxu0 %v143_v4 }
  0x11   :  { %135 = vmatmul.mubr.msk.bf16.vlgmr.msra.gmra.mxu0 %vm55_vm2, %v22_v5 }
  0xd1   :  { %v93_v7 = vpop.f32.mrf.mxu0 }
  0xd2   :  { %v99_v8 = vadd.f32 %v93_v7, %v21_v6 }
  0xd3   :  { %v136_v9 = vpop.f32.mrf.mxu0 }
  0xd4   :  { %101 = vst.msk [vmem:[#allocation2] sm:$0xff] %vm19_vm0, %v99_v8 }
  0xd5   :  { %v96_v11 = vpop.f32.mrf.mxu0 }
  0xd7   :  { %v137_v12 = vpop.f32.mrf.mxu0 }
  0xdb   :  { %v105_v14 = vld [vmem:[#allocation2] sm:$0xff] }
  0xdc   :  { %v108_v15 = vadd.f32 %v107_v13, %v105_v14 }
  0xde   :  { %v109_v16 = vpack.c.bf16 %v108_v15, %v108_v15 }
  0xe0   :  { %111 = vst.msk [vmem:[%s192_s3] sm:$0xf] %vm110_vm3, %v109_v16 }

</bundles_post_ra>
